<compile_context>
chip_gen: v6e
topology: v6e:2x2x1
jax: 0.10.0
libtpu: 0.0.40
codegen_flags: <defaults>
</compile_context>

<pallas_src>
import functools
import math

import jax
import jax.numpy as jnp
from jax import lax
from jax.experimental import pallas as pl
from jax.experimental.pallas import tpu as pltpu


NEG_INF = -1e9
CLASS_TOKEN_IDS = {0: 3919, 1: 8505}   # "no", "yes"


# ----------------------------- in-kernel helpers ----------------------------

def _ln(x, g, b, eps):
    mu = jnp.mean(x, axis=-1, keepdims=True)
    var = jnp.mean(jnp.square(x - mu), axis=-1, keepdims=True)
    return (x - mu) * lax.rsqrt(var + eps) * g + b


def _gelu_new(x):
    # GPT-2 "gelu_new" (tanh approximation), kept in f32 (v5e has no bf16 VPU).
    c = 0.7978845608028654  # sqrt(2/pi)
    return 0.5 * x * (1.0 + jnp.tanh(c * (x + 0.044715 * x * x * x)))


# --------------------------------- kernels ----------------------------------

def _ln_linear_kernel(x_ref, g_ref, b_ref, w_ref, bias_ref, o_ref, *, eps):
    # fused LayerNorm -> matmul (+bias).  bf16 MXU operands, f32 accumulation,
    # bf16 store (halves the [B*T, 3D] HBM writeback / re-read).
    h = _ln(x_ref[...].astype(jnp.float32), g_ref[...], b_ref[...], eps)
    o_ref[...] = (jnp.dot(h.astype(jnp.bfloat16), w_ref[...],
                          preferred_element_type=jnp.float32)
                  + bias_ref[...]).astype(o_ref.dtype)


def _ln_mlp_residual_kernel(x_ref, g_ref, b_ref, w1_ref, b1_ref, w2_ref, b2_ref,
                            o_ref, h_sc, acc_sc, *, eps):
    # fused LayerNorm -> fc -> gelu_new -> proj -> (+ residual), tiled over the
    # 4D hidden dimension (grid axis 1, "arbitrary") with an f32 accumulator.
    j = pl.program_id(1)
    nj = pl.num_programs(1)

    @pl.when(j == 0)
    def _():
        h_sc[...] = _ln(x_ref[...].astype(jnp.float32), g_ref[...],
                        b_ref[...], eps).astype(jnp.bfloat16)
        acc_sc[...] = jnp.zeros(acc_sc.shape, acc_sc.dtype)

    t = (jnp.dot(h_sc[...], w1_ref[...], preferred_element_type=jnp.float32)
         + b1_ref[...])
    t = _gelu_new(t)
    acc_sc[...] += jnp.dot(t.astype(jnp.bfloat16), w2_ref[...],
                           preferred_element_type=jnp.float32)

    @pl.when(j == nj - 1)
    def _():
        o_ref[...] = (x_ref[...].astype(jnp.float32) + acc_sc[...]
                      + b2_ref[...]).astype(o_ref.dtype)


def _flash_attn_kernel(q_ref, k_ref, v_ref, kval_ref, x_ref, w_o_ref, b_o_ref,
                       o_ref, m_sc, l_sc, acc_sc, out_sc, *, tq, tk):
    # flash-style attention: online softmax over KV tiles, per-head output
    # projection accumulated into out_sc, residual folded into the final store.
    qi = pl.program_id(1)
    h = pl.program_id(2)
    ki = pl.program_id(3)
    nh = pl.num_programs(2)
    nk = pl.num_programs(3)

    @pl.when(jnp.logical_and(h == 0, ki == 0))
    def _():
        out_sc[...] = jnp.zeros(out_sc.shape, out_sc.dtype)

    @pl.when(ki == 0)
    def _():
        m_sc[...] = jnp.full(m_sc.shape, -jnp.inf, m_sc.dtype)
        l_sc[...] = jnp.zeros(l_sc.shape, l_sc.dtype)
        acc_sc[...] = jnp.zeros(acc_sc.shape, acc_sc.dtype)

    # scores (tq, tk): contraction expressed without a transposed-operand copy;
    # the 1/sqrt(Dh) scale is already folded into the Q projection weights.
    s = lax.dot_general(q_ref[...], k_ref[...], (((1,), (1,)), ((), ())),
                        preferred_element_type=jnp.float32)

    # causal + key-padding additive mask built in-kernel (no [B,T,T] HBM mask).
    row = qi * tq + lax.broadcasted_iota(jnp.int32, (tq, tk), 0)
    col = ki * tk + lax.broadcasted_iota(jnp.int32, (tq, tk), 1)
    allow = (col <= row) & (kval_ref[...] > 0.5)          # (1, tk) broadcasts
    s = jnp.where(allow, s, NEG_INF)

    m_prev = m_sc[...]
    m_new = jnp.maximum(m_prev, jnp.max(s, axis=-1, keepdims=True))
    alpha = jnp.exp(m_prev - m_new)                        # f32 softmax math
    p = jnp.exp(s - m_new)
    l_sc[...] = alpha * l_sc[...] + jnp.sum(p, axis=-1, keepdims=True)
    acc_sc[...] = alpha * acc_sc[...] + jnp.dot(
        p.astype(jnp.bfloat16), v_ref[...], preferred_element_type=jnp.float32)
    m_sc[...] = m_new

    @pl.when(ki == nk - 1)
    def _():
        # normalize this head and fold it straight into the output projection
        # (w_o row-slice per head); no lane-axis concatenate of head outputs.
        o_h = acc_sc[...] * pl.reciprocal(l_sc[...], approx=True)
        out_sc[...] += jnp.dot(o_h.astype(jnp.bfloat16), w_o_ref[...],
                               preferred_element_type=jnp.float32)

    @pl.when(jnp.logical_and(h == nh - 1, ki == nk - 1))
    def _():
        o_ref[...] = (x_ref[...].astype(jnp.float32) + out_sc[...]
                      + b_o_ref[...]).astype(o_ref.dtype)


def _ln_class_head_kernel(x_ref, g_ref, b_ref, w_ref, o_ref, *, eps):
    # final LayerNorm fused with the 2-column (padded to 128 lanes)
    # tied-embedding class projection, applied only to the gathered rows.
    h = _ln(x_ref[...].astype(jnp.float32), g_ref[...], b_ref[...], eps)
    o_ref[...] = jnp.dot(h.astype(jnp.bfloat16), w_ref[...],
                         preferred_element_type=jnp.float32)


# ------------------------------ kernel wrappers ------------------------------

def _nbytes(shape, dtype):
    n = 1
    for s in shape:
        n *= s
    return n * jnp.dtype(dtype).itemsize


def _cparams(semantics, est_bytes):
    # explicit scoped-VMEM budget computed from the actual block working set.
    limit = int(min(max(2 * est_bytes, 8 * 1024 * 1024), 48 * 1024 * 1024))
    return pltpu.CompilerParams(dimension_semantics=semantics,
                                vmem_limit_bytes=limit)


def _const_spec(shape):
    # constant-index block: single-buffered (no pointless double buffer).
    return pl.BlockSpec(shape, lambda *_: (0,) * len(shape),
                        pipeline_mode=pl.Buffered(1))


def _row_tile(m, target):
    """Largest multiple-of-8 divisor of m that is <= target (fallback: m)."""
    if m % target == 0:
        return target
    best = None
    t = 8
    while t <= min(m, target):
        if m % t == 0:
            best = t
        t += 8
    return best if best is not None else m


def _col_tile(f, target=512):
    """Largest multiple-of-128 divisor of f that is <= target (fallback: f)."""
    if f <= target:
        return f
    best = f
    d = 128
    while d <= target:
        if f % d == 0:
            best = d
        d += 128
    return best


def _seq_tile(t, target=128):
    """Largest multiple-of-8 divisor of t that is <= target (fallback: t)."""
    if t <= target:
        return t
    best = t
    d = 8
    while d <= target:
        if t % d == 0:
            best = d
        d += 8
    return best


def ln_linear(x, gamma, beta, w, bias, eps=1e-5):
    M, D = x.shape
    N = w.shape[1]
    tm = _row_tile(M, 512)   # HBM-bound row kernel: big tiles (weights Buffered(1))
    est = (2 * _nbytes((tm, D), jnp.bfloat16)
           + 2 * _nbytes((tm, N), jnp.bfloat16)
           + _nbytes((D, N), jnp.bfloat16)
           + _nbytes((1, N), jnp.float32)
           + 2 * _nbytes((1, D), jnp.float32)
           + _nbytes((tm, N), jnp.float32))
    return pl.pallas_call(
        functools.partial(_ln_linear_kernel, eps=eps),
        out_shape=jax.ShapeDtypeStruct((M, N), jnp.bfloat16),
        grid=(M // tm,),
        in_specs=[pl.BlockSpec((tm, D), lambda i: (i, 0)),
                  _const_spec((1, D)),
                  _const_spec((1, D)),
                  _const_spec((D, N)),
                  _const_spec((1, N))],
        out_specs=pl.BlockSpec((tm, N), lambda i: (i, 0)),
        compiler_params=_cparams(("parallel",), est),
    )(x, gamma.reshape(1, D), beta.reshape(1, D), w, bias.reshape(1, N))


def ln_mlp_residual(x, gamma, beta, w1, b1, w2, b2, eps=1e-5):
    M, D = x.shape
    F_ = w1.shape[1]
    tm = _row_tile(M, 256)
    tf = _col_tile(F_, 512)
    est = (4 * _nbytes((tm, D), jnp.bfloat16)
           + 2 * (_nbytes((D, tf), jnp.bfloat16) + _nbytes((tf, D), jnp.bfloat16))
           + 2 * _nbytes((1, tf), jnp.float32)
           + 4 * _nbytes((1, D), jnp.float32)
           + _nbytes((tm, D), jnp.bfloat16)       # LN scratch
           + _nbytes((tm, D), jnp.float32)        # accumulator scratch
           + _nbytes((tm, tf), jnp.float32))      # post-fc intermediate
    return pl.pallas_call(
        functools.partial(_ln_mlp_residual_kernel, eps=eps),
        out_shape=jax.ShapeDtypeStruct((M, D), jnp.bfloat16),
        grid=(M // tm, F_ // tf),
        in_specs=[pl.BlockSpec((tm, D), lambda i, j: (i, 0)),
                  _const_spec((1, D)),
                  _const_spec((1, D)),
                  pl.BlockSpec((D, tf), lambda i, j: (0, j)),
                  pl.BlockSpec((1, tf), lambda i, j: (0, j)),
                  pl.BlockSpec((tf, D), lambda i, j: (j, 0)),
                  _const_spec((1, D))],
        out_specs=pl.BlockSpec((tm, D), lambda i, j: (i, 0)),
        scratch_shapes=[pltpu.VMEM((tm, D), jnp.bfloat16),
                        pltpu.VMEM((tm, D), jnp.float32)],
        compiler_params=_cparams(("parallel", "arbitrary"), est),
    )(x, gamma.reshape(1, D), beta.reshape(1, D),
      w1, b1.reshape(1, F_), w2, b2.reshape(1, D))


def flash_attn_block(q, k, v, key_valid, x, w_o, b_o):
    # q/k/v: [B, H, T, Dh] bf16 (head-major); key_valid: [B, 1, T] f32;
    # x (residual): [B, T, D] bf16; output: [B, T, D] bf16.
    B, H, T, Dh = q.shape
    D = H * Dh
    tq = _seq_tile(T)
    tk = _seq_tile(T)
    est = (2 * _nbytes((tq, Dh), jnp.bfloat16)
           + 4 * _nbytes((tk, Dh), jnp.bfloat16)
           + 2 * _nbytes((1, tk), jnp.float32)
           + 4 * _nbytes((tq, D), jnp.bfloat16)
           + 2 * _nbytes((Dh, D), jnp.bfloat16)
           + _nbytes((1, D), jnp.float32)
           + _nbytes((tq, D), jnp.float32) + _nbytes((tq, Dh), jnp.float32)
           + 2 * _nbytes((tq, 1), jnp.float32)
           + 2 * _nbytes((tq, tk), jnp.float32))
    return pl.pallas_call(
        functools.partial(_flash_attn_kernel, tq=tq, tk=tk),
        out_shape=jax.ShapeDtypeStruct((B, T, D), jnp.bfloat16),
        grid=(B, T // tq, H, T // tk),
        in_specs=[
            pl.BlockSpec((None, None, tq, Dh), lambda b, qi, h, ki: (b, h, qi, 0)),
            pl.BlockSpec((None, None, tk, Dh), lambda b, qi, h, ki: (b, h, ki, 0)),
            pl.BlockSpec((None, None, tk, Dh), lambda b, qi, h, ki: (b, h, ki, 0)),
            pl.BlockSpec((None, 1, tk), lambda b, qi, h, ki: (b, 0, ki)),
            pl.BlockSpec((None, tq, D), lambda b, qi, h, ki: (b, qi, 0)),
            pl.BlockSpec((Dh, D), lambda b, qi, h, ki: (h, 0)),
            _const_spec((1, D)),
        ],
        out_specs=pl.BlockSpec((None, tq, D), lambda b, qi, h, ki: (b, qi, 0)),
        scratch_shapes=[pltpu.VMEM((tq, 1), jnp.float32),
                        pltpu.VMEM((tq, 1), jnp.float32),
                        pltpu.VMEM((tq, Dh), jnp.float32),
                        pltpu.VMEM((tq, D), jnp.float32)],
        compiler_params=_cparams(
            ("parallel", "parallel", "arbitrary", "arbitrary"), est),
    )(q, k, v, key_valid, x, w_o, b_o.reshape(1, D))


def ln_class_head(h_last, gamma, beta, w_cls, eps=1e-5):
    # h_last: [B, D] bf16; w_cls: [D, 128] (cols 0/1 = "no"/"yes" wte rows).
    B, D = h_last.shape
    N = w_cls.shape[1]
    return pl.pallas_call(
        functools.partial(_ln_class_head_kernel, eps=eps),
        out_shape=jax.ShapeDtypeStruct((B, N), jnp.float32),
        grid=(1,),
        in_specs=[pl.BlockSpec((B, D), lambda i: (0, 0)),
                  pl.BlockSpec((1, D), lambda i: (0, 0)),
                  pl.BlockSpec((1, D), lambda i: (0, 0)),
                  pl.BlockSpec((D, N), lambda i: (0, 0))],
        out_specs=pl.BlockSpec((B, N), lambda i: (0, 0)),
        compiler_params=_cparams(("arbitrary",), 1 << 20),
    )(h_last, gamma.reshape(1, D), beta.reshape(1, D), w_cls)


# ------------------------------ model (glue) --------------------------------

def init_params(key, *, vocab, max_pos, d, n_layers, num_heads):
    std = 0.02
    dh = d // num_heads
    # Fold the 1/sqrt(Dh) attention scale into the Q projection columns
    # (mathematically identical to scaling the scores; zero runtime cost).
    qkv_col_scale = jnp.concatenate([
        jnp.full((d,), 1.0 / math.sqrt(dh), jnp.float32),
        jnp.ones((2 * d,), jnp.float32)])
    keys = jax.random.split(key, 2 + n_layers)
    wte = jax.random.normal(keys[0], (vocab, d), jnp.float32) * std
    wpe = jax.random.normal(keys[1], (max_pos, d), jnp.float32) * std
    # Tied-embedding class head: only the "no"/"yes" rows of wte are needed.
    # Built once at init as a lane-dense [D, 128] bf16 matrix.
    class_rows = wte[jnp.array([CLASS_TOKEN_IDS[0], CLASS_TOKEN_IDS[1]])]  # [2,D]
    w_cls = jnp.zeros((d, 128), jnp.bfloat16).at[:, :2].set(
        class_rows.T.astype(jnp.bfloat16))
    params = {
        "wte": wte,
        "wpe": wpe,
        "w_cls": w_cls,
        "layers": [],
        "lnf_g": jnp.ones((d,), jnp.float32),
        "lnf_b": jnp.zeros((d,), jnp.float32),
    }
    for li in range(n_layers):
        lk = jax.random.split(keys[2 + li], 4)
        # matmul weights stored bf16 (MXU operands), biases / LN params f32.
        params["layers"].append({
            "ln1_g": jnp.ones((d,), jnp.float32),
            "ln1_b": jnp.zeros((d,), jnp.float32),
            "w_qkv": (jax.random.normal(lk[0], (d, 3 * d), jnp.float32) * std
                      * qkv_col_scale[None, :]).astype(jnp.bfloat16),
            "b_qkv": jnp.zeros((3 * d,), jnp.float32),  # scale-fold no-op on zeros
            "w_o": (jax.random.normal(lk[1], (d, d), jnp.float32)
                    * std).astype(jnp.bfloat16),
            "b_o": jnp.zeros((d,), jnp.float32),
            "ln2_g": jnp.ones((d,), jnp.float32),
            "ln2_b": jnp.zeros((d,), jnp.float32),
            "w_fc": (jax.random.normal(lk[2], (d, 4 * d), jnp.float32)
                     * std).astype(jnp.bfloat16),
            "b_fc": jnp.zeros((4 * d,), jnp.float32),
            "w_proj": (jax.random.normal(lk[3], (4 * d, d), jnp.float32)
                       * std).astype(jnp.bfloat16),
            "b_proj": jnp.zeros((d,), jnp.float32),
        })
    return params


def paraphrase_gpt_forward(params, input_ids, attention_mask, *, num_heads):
    B, T = input_ids.shape
    wte, wpe = params["wte"], params["wpe"]
    D = wte.shape[1]
    Dh = D // num_heads

    # Embedding lookup (XLA glue); residual stream kept bf16 between kernels.
    x = (wte[input_ids] + wpe[jnp.arange(T)][None, :, :]).astype(jnp.bfloat16)
    key_valid = attention_mask.astype(jnp.float32).reshape(B, 1, T)

    for layer in params["layers"]:
        # --- self-attention block (pre-LN), ln1 fused into QKV projection ---
        qkv = ln_linear(x.reshape(B * T, D), layer["ln1_g"], layer["ln1_b"],
                        layer["w_qkv"], layer["b_qkv"])        # [B*T, 3D] bf16
        # head-major split to [3, B, H, T, Dh] (QKV columns are already ordered
        # (qkv, head, dh), matching GPT-2's per-head column layout).
        qkv = qkv.reshape(B, T, 3, num_heads, Dh).transpose(2, 0, 3, 1, 4)
        x = flash_attn_block(qkv[0], qkv[1], qkv[2], key_valid, x,
                             layer["w_o"], layer["b_o"])       # [B, T, D] bf16

        # --- MLP block (pre-LN), ln2 + fc + gelu + proj + residual fused ---
        x = ln_mlp_residual(x.reshape(B * T, D), layer["ln2_g"], layer["ln2_b"],
                            layer["w_fc"], layer["b_fc"],
                            layer["w_proj"], layer["b_proj"]).reshape(B, T, D)

    # Last-token gather BEFORE the final LayerNorm (LN is per-row, so it
    # commutes with the gather); fused LN + class head on only [B, D] rows.
    last_idx = jnp.maximum(jnp.sum(attention_mask, axis=1) - 1, 0)   # clamp >= 0
    h_last = x[jnp.arange(B), last_idx, :]                           # [B, D] bf16
    logits = ln_class_head(h_last, params["lnf_g"], params["lnf_b"],
                           params["w_cls"])                          # [B, 128] f32
    return logits[:, :2]                                             # (no, yes)


# ---------------------------------- main ------------------------------------

if __name__ == "__main__":
    B, T, D, L, H = 2, 8, 32, 2, 2
    VOCAB, MAX_POS = 8704, 64   # vocab must cover class token ids 3919 / 8505

    key = jax.random.PRNGKey(0)
    pkey, ikey = jax.random.split(key)
    params = init_params(pkey, vocab=VOCAB, max_pos=MAX_POS, d=D, n_layers=L,
                         num_heads=H)

    input_ids = jax.random.randint(ikey, (B, T), 0, VOCAB, dtype=jnp.int32)
    attention_mask = jnp.array([[1, 1, 1, 1, 1, 1, 0, 0],
                                [1, 1, 1, 1, 1, 1, 1, 1]], dtype=jnp.int32)

    fwd = jax.jit(functools.partial(paraphrase_gpt_forward, num_heads=H))
    binary_logits = fwd(params, input_ids, attention_mask)
    jax.block_until_ready(binary_logits)
    assert binary_logits.shape == (B, 2)
    assert binary_logits.dtype == jnp.float32
    print("KERNEL_OK")
</pallas_src>

<mosaic_0001>
module attributes {stable_mosaic.version = 11 : i64} {
  func.func @_ln_linear_kernel(%arg0: i32, %arg1: memref<16x32xbf16, #tpu.memory_space<vmem>>, %arg2: memref<1x32xf32, #tpu.memory_space<vmem>>, %arg3: memref<1x32xf32, #tpu.memory_space<vmem>>, %arg4: memref<32x96xbf16, #tpu.memory_space<vmem>>, %arg5: memref<1x96xf32, #tpu.memory_space<vmem>>, %arg6: memref<16x96xbf16, #tpu.memory_space<vmem>>) attributes {dimension_semantics = [#tpu.dimension_semantics<parallel>], iteration_bounds = array<i64: 1>, scalar_prefetch = 0 : i64, scratch_operands = 0 : i64, tpu.core_type = #tpu.core_type<tc>, window_params = [{transform_indices = @transform_0, window_bounds = array<i64: 16, 32>}, {pipeline_mode = #tpu.pipeline_mode<synchronous>, transform_indices = @transform_1, window_bounds = array<i64: 1, 32>}, {pipeline_mode = #tpu.pipeline_mode<synchronous>, transform_indices = @transform_2, window_bounds = array<i64: 1, 32>}, {pipeline_mode = #tpu.pipeline_mode<synchronous>, transform_indices = @transform_3, window_bounds = array<i64: 32, 96>}, {pipeline_mode = #tpu.pipeline_mode<synchronous>, transform_indices = @transform_4, window_bounds = array<i64: 1, 96>}, {transform_indices = @transform_5, window_bounds = array<i64: 16, 96>}]} {
    %c0 = arith.constant 0 : index
    %c0_0 = arith.constant 0 : index
    %0 = vector.load %arg1[%c0, %c0_0] : memref<16x32xbf16, #tpu.memory_space<vmem>>, vector<16x32xbf16>
    %1 = arith.extf %0 : vector<16x32xbf16> to vector<16x32xf32>
    %c0_1 = arith.constant 0 : index
    %c0_2 = arith.constant 0 : index
    %2 = vector.load %arg2[%c0_1, %c0_2] : memref<1x32xf32, #tpu.memory_space<vmem>>, vector<1x32xf32>
    %c0_3 = arith.constant 0 : index
    %c0_4 = arith.constant 0 : index
    %3 = vector.load %arg3[%c0_3, %c0_4] : memref<1x32xf32, #tpu.memory_space<vmem>>, vector<1x32xf32>
    %cst = arith.constant dense<0.000000e+00> : vector<16xf32>
    %4 = vector.multi_reduction <add>, %1, %cst [1] : vector<16x32xf32> to vector<16xf32>
    %5 = vector.shape_cast %4 : vector<16xf32> to vector<16x1xf32>
    %cst_5 = arith.constant 3.200000e+01 : f32
    %6 = vector.broadcast %cst_5 : f32 to vector<16x1xf32>
    %7 = arith.divf %5, %6 : vector<16x1xf32>
    %8 = vector.broadcast %7 : vector<16x1xf32> to vector<16x32xf32>
    %9 = arith.subf %1, %8 : vector<16x32xf32>
    %10 = arith.mulf %9, %9 : vector<16x32xf32>
    %cst_6 = arith.constant dense<0.000000e+00> : vector<16xf32>
    %11 = vector.multi_reduction <add>, %10, %cst_6 [1] : vector<16x32xf32> to vector<16xf32>
    %12 = vector.shape_cast %11 : vector<16xf32> to vector<16x1xf32>
    %cst_7 = arith.constant 3.200000e+01 : f32
    %13 = vector.broadcast %cst_7 : f32 to vector<16x1xf32>
    %14 = arith.divf %12, %13 : vector<16x1xf32>
    %15 = vector.broadcast %7 : vector<16x1xf32> to vector<16x32xf32>
    %16 = arith.subf %1, %15 : vector<16x32xf32>
    %cst_8 = arith.constant 9.99999974E-6 : f32
    %17 = vector.broadcast %cst_8 : f32 to vector<16x1xf32>
    %18 = arith.addf %14, %17 : vector<16x1xf32>
    %19 = math.rsqrt %18 : vector<16x1xf32>
    %20 = vector.broadcast %19 : vector<16x1xf32> to vector<16x32xf32>
    %21 = arith.mulf %16, %20 : vector<16x32xf32>
    %22 = vector.broadcast %2 : vector<1x32xf32> to vector<16x32xf32>
    %23 = arith.mulf %21, %22 : vector<16x32xf32>
    %24 = vector.broadcast %3 : vector<1x32xf32> to vector<16x32xf32>
    %25 = arith.addf %23, %24 : vector<16x32xf32>
    %26 = arith.truncf %25 : vector<16x32xf32> to vector<16x32xbf16>
    %c0_9 = arith.constant 0 : index
    %c0_10 = arith.constant 0 : index
    %27 = vector.load %arg4[%c0_9, %c0_10] : memref<32x96xbf16, #tpu.memory_space<vmem>>, vector<32x96xbf16>
    %cst_11 = arith.constant dense<0.000000e+00> : vector<16x96xf32>
    %28 = tpu.matmul %26, %27, %cst_11 {dimension_numbers = #tpu.dot_dimension_numbers<[1], [0], [0], [1], [0, 0, 1, 1], [], []>} : vector<16x32xbf16>, vector<32x96xbf16>, vector<16x96xf32> -> vector<16x96xf32>
    %c0_12 = arith.constant 0 : index
    %c0_13 = arith.constant 0 : index
    %29 = vector.load %arg5[%c0_12, %c0_13] : memref<1x96xf32, #tpu.memory_space<vmem>>, vector<1x96xf32>
    %30 = vector.broadcast %29 : vector<1x96xf32> to vector<16x96xf32>
    %31 = arith.addf %28, %30 : vector<16x96xf32>
    %32 = arith.truncf %31 : vector<16x96xf32> to vector<16x96xbf16>
    %c0_14 = arith.constant 0 : index
    %c0_15 = arith.constant 0 : index
    %33 = vector.load %arg6[%c0_14, %c0_15] : memref<16x96xbf16, #tpu.memory_space<vmem>>, vector<16x96xbf16>
    tpu.vector_store %arg6[%c0_14, %c0_15], %32 {strides = array<i32>} : memref<16x96xbf16, #tpu.memory_space<vmem>>, vector<16x96xbf16>,
    return
  }
  func.func @transform_0(%arg0: i32) -> (i32, i32) {
    %c0_i32 = arith.constant 0 : i32
    %c0_i32_0 = arith.constant 0 : i32
    return %arg0, %c0_i32 : i32, i32
  }
  func.func @transform_1(%arg0: i32) -> (i32, i32) {
    %c0_i32 = arith.constant 0 : i32
    %c0_i32_0 = arith.constant 0 : i32
    %c0_i32_1 = arith.constant 0 : i32
    return %c0_i32, %c0_i32_0 : i32, i32
  }
  func.func @transform_2(%arg0: i32) -> (i32, i32) {
    %c0_i32 = arith.constant 0 : i32
    %c0_i32_0 = arith.constant 0 : i32
    %c0_i32_1 = arith.constant 0 : i32
    return %c0_i32, %c0_i32_0 : i32, i32
  }
  func.func @transform_3(%arg0: i32) -> (i32, i32) {
    %c0_i32 = arith.constant 0 : i32
    %c0_i32_0 = arith.constant 0 : i32
    %c0_i32_1 = arith.constant 0 : i32
    return %c0_i32, %c0_i32_0 : i32, i32
  }
  func.func @transform_4(%arg0: i32) -> (i32, i32) {
    %c0_i32 = arith.constant 0 : i32
    %c0_i32_0 = arith.constant 0 : i32
    %c0_i32_1 = arith.constant 0 : i32
    return %c0_i32, %c0_i32_0 : i32, i32
  }
  func.func @transform_5(%arg0: i32) -> (i32, i32) {
    %c0_i32 = arith.constant 0 : i32
    %c0_i32_0 = arith.constant 0 : i32
    return %arg0, %c0_i32 : i32, i32
  }
}

module attributes {stable_mosaic.version = 11 : i64} {
  func.func @_flash_attn_kernel(%arg0: i32, %arg1: i32, %arg2: i32, %arg3: i32, %arg4: memref<1x1x8x16xbf16, #tpu.memory_space<vmem>>, %arg5: memref<1x1x8x16xbf16, #tpu.memory_space<vmem>>, %arg6: memref<1x1x8x16xbf16, #tpu.memory_space<vmem>>, %arg7: memref<1x1x8xf32, #tpu.memory_space<vmem>>, %arg8: memref<1x8x32xbf16, #tpu.memory_space<vmem>>, %arg9: memref<16x32xbf16, #tpu.memory_space<vmem>>, %arg10: memref<1x32xf32, #tpu.memory_space<vmem>>, %arg11: memref<1x8x32xbf16, #tpu.memory_space<vmem>>, %arg12: memref<8x1xf32, #tpu.memory_space<vmem>>, %arg13: memref<8x1xf32, #tpu.memory_space<vmem>>, %arg14: memref<8x16xf32, #tpu.memory_space<vmem>>, %arg15: memref<8x32xf32, #tpu.memory_space<vmem>>) attributes {dimension_semantics = [#tpu.dimension_semantics<parallel>, #tpu.dimension_semantics<parallel>, #tpu.dimension_semantics<arbitrary>, #tpu.dimension_semantics<arbitrary>], iteration_bounds = array<i64: 2, 1, 2, 1>, scalar_prefetch = 0 : i64, scratch_operands = 4 : i64, tpu.core_type = #tpu.core_type<tc>, window_params = [{transform_indices = @transform_0, window_bounds = array<i64: 1, 1, 8, 16>}, {transform_indices = @transform_1, window_bounds = array<i64: 1, 1, 8, 16>}, {transform_indices = @transform_2, window_bounds = array<i64: 1, 1, 8, 16>}, {transform_indices = @transform_3, window_bounds = array<i64: 1, 1, 8>}, {transform_indices = @transform_4, window_bounds = array<i64: 1, 8, 32>}, {transform_indices = @transform_5, window_bounds = array<i64: 16, 32>}, {pipeline_mode = #tpu.pipeline_mode<synchronous>, transform_indices = @transform_6, window_bounds = array<i64: 1, 32>}, {transform_indices = @transform_7, window_bounds = array<i64: 1, 8, 32>}]} {
    %c0_i32 = arith.constant 0 : i32
    %0 = arith.cmpi eq, %arg2, %c0_i32 : i32
    %c0_i32_0 = arith.constant 0 : i32
    %1 = arith.cmpi eq, %arg3, %c0_i32_0 : i32
    %2 = arith.andi %0, %1 : i1
    %3 = arith.extui %2 : i1 to i32
    %c0_i32_1 = arith.constant 0 : i32
    %4 = arith.cmpi ne, %3, %c0_i32_1 : i32
    scf.if %4 {
      %cst_40 = arith.constant 0.000000e+00 : f32
      %63 = vector.broadcast %cst_40 : f32 to vector<8x32xf32>
      %c0_41 = arith.constant 0 : index
      %c0_42 = arith.constant 0 : index
      %64 = vector.load %arg15[%c0_41, %c0_42] : memref<8x32xf32, #tpu.memory_space<vmem>>, vector<8x32xf32>
      tpu.vector_store %arg15[%c0_41, %c0_42], %63 {strides = array<i32>} : memref<8x32xf32, #tpu.memory_space<vmem>>, vector<8x32xf32>,
    } else {
    }
    %c0_i32_2 = arith.constant 0 : i32
    %5 = arith.cmpi eq, %arg3, %c0_i32_2 : i32
    %6 = arith.extui %5 : i1 to i32
    %c0_i32_3 = arith.constant 0 : i32
    %7 = arith.cmpi ne, %6, %c0_i32_3 : i32
    scf.if %7 {
      %cst_40 = arith.constant 0xFF800000 : f32
      %63 = vector.broadcast %cst_40 : f32 to vector<8x1xf32>
      %c0_41 = arith.constant 0 : index
      %c0_42 = arith.constant 0 : index
      %64 = vector.load %arg12[%c0_41, %c0_42] : memref<8x1xf32, #tpu.memory_space<vmem>>, vector<8x1xf32>
      tpu.vector_store %arg12[%c0_41, %c0_42], %63 {strides = array<i32>} : memref<8x1xf32, #tpu.memory_space<vmem>>, vector<8x1xf32>,
      %cst_43 = arith.constant 0.000000e+00 : f32
      %65 = vector.broadcast %cst_43 : f32 to vector<8x1xf32>
      %c0_44 = arith.constant 0 : index
      %c0_45 = arith.constant 0 : index
      %66 = vector.load %arg13[%c0_44, %c0_45] : memref<8x1xf32, #tpu.memory_space<vmem>>, vector<8x1xf32>
      tpu.vector_store %arg13[%c0_44, %c0_45], %65 {strides = array<i32>} : memref<8x1xf32, #tpu.memory_space<vmem>>, vector<8x1xf32>,
      %cst_46 = arith.constant 0.000000e+00 : f32
      %67 = vector.broadcast %cst_46 : f32 to vector<8x16xf32>
      %c0_47 = arith.constant 0 : index
      %c0_48 = arith.constant 0 : index
      %68 = vector.load %arg14[%c0_47, %c0_48] : memref<8x16xf32, #tpu.memory_space<vmem>>, vector<8x16xf32>
      tpu.vector_store %arg14[%c0_47, %c0_48], %67 {strides = array<i32>} : memref<8x16xf32, #tpu.memory_space<vmem>>, vector<8x16xf32>,
    } else {
    }
    %c0 = arith.constant 0 : index
    %c0_4 = arith.constant 0 : index
    %c0_5 = arith.constant 0 : index
    %c0_6 = arith.constant 0 : index
    %8 = vector.load %arg4[%c0, %c0_4, %c0_5, %c0_6] : memref<1x1x8x16xbf16, #tpu.memory_space<vmem>>, vector<1x1x8x16xbf16>
    %9 = vector.shape_cast %8 : vector<1x1x8x16xbf16> to vector<8x16xbf16>
    %c0_7 = arith.constant 0 : index
    %c0_8 = arith.constant 0 : index
    %c0_9 = arith.constant 0 : index
    %c0_10 = arith.constant 0 : index
    %10 = vector.load %arg5[%c0_7, %c0_8, %c0_9, %c0_10] : memref<1x1x8x16xbf16, #tpu.memory_space<vmem>>, vector<1x1x8x16xbf16>
    %11 = vector.shape_cast %10 : vector<1x1x8x16xbf16> to vector<8x16xbf16>
    %cst = arith.constant dense<0.000000e+00> : vector<8x8xf32>
    %12 = tpu.matmul %9, %11, %cst {dimension_numbers = #tpu.dot_dimension_numbers<[1], [1], [0], [0], [0, 0, 1, 0], [], []>} : vector<8x16xbf16>, vector<8x16xbf16>, vector<8x8xf32> -> vector<8x8xf32>
    %c8_i32 = arith.constant 8 : i32
    %13 = arith.muli %arg1, %c8_i32 : i32
    %14 = tpu.iota {dimensions = array<i32: 0>} : vector<8x8xi32>
    %15 = vector.broadcast %13 : i32 to vector<8x8xi32>
    %16 = arith.addi %15, %14 : vector<8x8xi32>
    %c8_i32_11 = arith.constant 8 : i32
    %17 = arith.muli %arg3, %c8_i32_11 : i32
    %18 = tpu.iota {dimensions = array<i32: 1>} : vector<8x8xi32>
    %19 = vector.broadcast %17 : i32 to vector<8x8xi32>
    %20 = arith.addi %19, %18 : vector<8x8xi32>
    %21 = arith.cmpi sle, %20, %16 : vector<8x8xi32>
    %c0_12 = arith.constant 0 : index
    %c0_13 = arith.constant 0 : index
    %c0_14 = arith.constant 0 : index
    %22 = vector.load %arg7[%c0_12, %c0_13, %c0_14] : memref<1x1x8xf32, #tpu.memory_space<vmem>>, vector<1x1x8xf32>
    %23 = vector.shape_cast %22 : vector<1x1x8xf32> to vector<1x8xf32>
    %cst_15 = arith.constant 5.000000e-01 : f32
    %24 = vector.broadcast %cst_15 : f32 to vector<1x8xf32>
    %25 = arith.cmpf ogt, %23, %24 : vector<1x8xf32>
    %26 = vector.broadcast %25 : vector<1x8xi1> to vector<8x8xi1>
    %27 = arith.andi %21, %26 : vector<8x8xi1>
    %cst_16 = arith.constant -1.000000e+09 : f32
    %28 = vector.broadcast %cst_16 : f32 to vector<8x8xf32>
    %29 = arith.select %27, %12, %28 : vector<8x8xi1>, vector<8x8xf32>
    %c0_17 = arith.constant 0 : index
    %c0_18 = arith.constant 0 : index
    %30 = vector.load %arg12[%c0_17, %c0_18] : memref<8x1xf32, #tpu.memory_space<vmem>>, vector<8x1xf32>
    %cst_19 = arith.constant dense<0xFF800000> : vector<8xf32>
    %31 = vector.multi_reduction <maximumf>, %29, %cst_19 [1] : vector<8x8xf32> to vector<8xf32>
    %32 = vector.shape_cast %31 : vector<8xf32> to vector<8x1xf32>
    %33 = arith.maximumf %30, %32 : vector<8x1xf32>
    %34 = arith.subf %30, %33 : vector<8x1xf32>
    %35 = math.exp %34 : vector<8x1xf32>
    %36 = vector.broadcast %33 : vector<8x1xf32> to vector<8x8xf32>
    %37 = arith.subf %29, %36 : vector<8x8xf32>
    %38 = math.exp %37 : vector<8x8xf32>
    %c0_20 = arith.constant 0 : index
    %c0_21 = arith.constant 0 : index
    %39 = vector.load %arg13[%c0_20, %c0_21] : memref<8x1xf32, #tpu.memory_space<vmem>>, vector<8x1xf32>
    %40 = arith.mulf %35, %39 : vector<8x1xf32>
    %cst_22 = arith.constant dense<0.000000e+00> : vector<8xf32>
    %41 = vector.multi_reduction <add>, %38, %cst_22 [1] : vector<8x8xf32> to vector<8xf32>
    %42 = vector.shape_cast %41 : vector<8xf32> to vector<8x1xf32>
    %43 = arith.addf %40, %42 : vector<8x1xf32>
    %c0_23 = arith.constant 0 : index
    %c0_24 = arith.constant 0 : index
    %44 = vector.load %arg13[%c0_23, %c0_24] : memref<8x1xf32, #tpu.memory_space<vmem>>, vector<8x1xf32>
    tpu.vector_store %arg13[%c0_23, %c0_24], %43 {strides = array<i32>} : memref<8x1xf32, #tpu.memory_space<vmem>>, vector<8x1xf32>,
    %c0_25 = arith.constant 0 : index
    %c0_26 = arith.constant 0 : index
    %45 = vector.load %arg14[%c0_25, %c0_26] : memref<8x16xf32, #tpu.memory_space<vmem>>, vector<8x16xf32>
    %46 = vector.broadcast %35 : vector<8x1xf32> to vector<8x16xf32>
    %47 = arith.mulf %46, %45 : vector<8x16xf32>
    %48 = arith.truncf %38 : vector<8x8xf32> to vector<8x8xbf16>
    %c0_27 = arith.constant 0 : index
    %c0_28 = arith.constant 0 : index
    %c0_29 = arith.constant 0 : index
    %c0_30 = arith.constant 0 : index
    %49 = vector.load %arg6[%c0_27, %c0_28, %c0_29, %c0_30] : memref<1x1x8x16xbf16, #tpu.memory_space<vmem>>, vector<1x1x8x16xbf16>
    %50 = vector.shape_cast %49 : vector<1x1x8x16xbf16> to vector<8x16xbf16>
    %cst_31 = arith.constant dense<0.000000e+00> : vector<8x16xf32>
    %51 = tpu.matmul %48, %50, %cst_31 {dimension_numbers = #tpu.dot_dimension_numbers<[1], [0], [0], [1], [0, 0, 1, 1], [], []>} : vector<8x8xbf16>, vector<8x16xbf16>, vector<8x16xf32> -> vector<8x16xf32>
    %52 = arith.addf %47, %51 : vector<8x16xf32>
    %c0_32 = arith.constant 0 : index
    %c0_33 = arith.constant 0 : index
    %53 = vector.load %arg14[%c0_32, %c0_33] : memref<8x16xf32, #tpu.memory_space<vmem>>, vector<8x16xf32>
    tpu.vector_store %arg14[%c0_32, %c0_33], %52 {strides = array<i32>} : memref<8x16xf32, #tpu.memory_space<vmem>>, vector<8x16xf32>,
    %c0_34 = arith.constant 0 : index
    %c0_35 = arith.constant 0 : index
    %54 = vector.load %arg12[%c0_34, %c0_35] : memref<8x1xf32, #tpu.memory_space<vmem>>, vector<8x1xf32>
    tpu.vector_store %arg12[%c0_34, %c0_35], %33 {strides = array<i32>} : memref<8x1xf32, #tpu.memory_space<vmem>>, vector<8x1xf32>,
    %c0_i32_36 = arith.constant 0 : i32
    %55 = arith.cmpi eq, %arg3, %c0_i32_36 : i32
    %56 = arith.extui %55 : i1 to i32
    %c0_i32_37 = arith.constant 0 : i32
    %57 = arith.cmpi ne, %56, %c0_i32_37 : i32
    scf.if %57 {
      %c0_40 = arith.constant 0 : index
      %c0_41 = arith.constant 0 : index
      %63 = vector.load %arg14[%c0_40, %c0_41] : memref<8x16xf32, #tpu.memory_space<vmem>>, vector<8x16xf32>
      %c0_42 = arith.constant 0 : index
      %c0_43 = arith.constant 0 : index
      %64 = vector.load %arg13[%c0_42, %c0_43] : memref<8x1xf32, #tpu.memory_space<vmem>>, vector<8x1xf32>
      %65 = tpu.reciprocal %64 {approx = true} : vector<8x1xf32> -> vector<8x1xf32>
      %66 = vector.broadcast %65 : vector<8x1xf32> to vector<8x16xf32>
      %67 = arith.mulf %63, %66 : vector<8x16xf32>
      %c0_44 = arith.constant 0 : index
      %c0_45 = arith.constant 0 : index
      %68 = vector.load %arg15[%c0_44, %c0_45] : memref<8x32xf32, #tpu.memory_space<vmem>>, vector<8x32xf32>
      %69 = arith.truncf %67 : vector<8x16xf32> to vector<8x16xbf16>
      %c0_46 = arith.constant 0 : index
      %c0_47 = arith.constant 0 : index
      %70 = vector.load %arg9[%c0_46, %c0_47] : memref<16x32xbf16, #tpu.memory_space<vmem>>, vector<16x32xbf16>
      %cst_48 = arith.constant dense<0.000000e+00> : vector<8x32xf32>
      %71 = tpu.matmul %69, %70, %cst_48 {dimension_numbers = #tpu.dot_dimension_numbers<[1], [0], [0], [1], [0, 0, 1, 1], [], []>} : vector<8x16xbf16>, vector<16x32xbf16>, vector<8x32xf32> -> vector<8x32xf32>
      %72 = arith.addf %68, %71 : vector<8x32xf32>
      %c0_49 = arith.constant 0 : index
      %c0_50 = arith.constant 0 : index
      %73 = vector.load %arg15[%c0_49, %c0_50] : memref<8x32xf32, #tpu.memory_space<vmem>>, vector<8x32xf32>
      tpu.vector_store %arg15[%c0_49, %c0_50], %72 {strides = array<i32>} : memref<8x32xf32, #tpu.memory_space<vmem>>, vector<8x32xf32>,
    } else {
    }
    %c1_i32 = arith.constant 1 : i32
    %58 = arith.cmpi eq, %arg2, %c1_i32 : i32
    %c0_i32_38 = arith.constant 0 : i32
    %59 = arith.cmpi eq, %arg3, %c0_i32_38 : i32
    %60 = arith.andi %58, %59 : i1
    %61 = arith.extui %60 : i1 to i32
    %c0_i32_39 = arith.constant 0 : i32
    %62 = arith.cmpi ne, %61, %c0_i32_39 : i32
    scf.if %62 {
      %c0_40 = arith.constant 0 : index
      %c0_41 = arith.constant 0 : index
      %c0_42 = arith.constant 0 : index
      %63 = vector.load %arg8[%c0_40, %c0_41, %c0_42] : memref<1x8x32xbf16, #tpu.memory_space<vmem>>, vector<1x8x32xbf16>
      %64 = vector.shape_cast %63 : vector<1x8x32xbf16> to vector<8x32xbf16>
      %65 = arith.extf %64 : vector<8x32xbf16> to vector<8x32xf32>
      %c0_43 = arith.constant 0 : index
      %c0_44 = arith.constant 0 : index
      %66 = vector.load %arg15[%c0_43, %c0_44] : memref<8x32xf32, #tpu.memory_space<vmem>>, vector<8x32xf32>
      %67 = arith.addf %65, %66 : vector<8x32xf32>
      %c0_45 = arith.constant 0 : index
      %c0_46 = arith.constant 0 : index
      %68 = vector.load %arg10[%c0_45, %c0_46] : memref<1x32xf32, #tpu.memory_space<vmem>>, vector<1x32xf32>
      %69 = vector.broadcast %68 : vector<1x32xf32> to vector<8x32xf32>
      %70 = arith.addf %67, %69 : vector<8x32xf32>
      %71 = arith.truncf %70 : vector<8x32xf32> to vector<8x32xbf16>
      %c0_47 = arith.constant 0 : index
      %c0_48 = arith.constant 0 : index
      %c0_49 = arith.constant 0 : index
      %72 = vector.load %arg11[%c0_47, %c0_48, %c0_49] : memref<1x8x32xbf16, #tpu.memory_space<vmem>>, vector<1x8x32xbf16>
      %73 = vector.shape_cast %72 : vector<1x8x32xbf16> to vector<8x32xbf16>
      %74 = vector.shape_cast %71 : vector<8x32xbf16> to vector<1x8x32xbf16>
      tpu.vector_store %arg11[%c0_47, %c0_48, %c0_49], %74 {strides = array<i32>} : memref<1x8x32xbf16, #tpu.memory_space<vmem>>, vector<1x8x32xbf16>,
    } else {
    }
    return
  }
  func.func @transform_0(%arg0: i32, %arg1: i32, %arg2: i32, %arg3: i32) -> (i32, i32, i32, i32) {
    %c0_i32 = arith.constant 0 : i32
    %c0_i32_0 = arith.constant 0 : i32
    return %arg0, %arg2, %arg1, %c0_i32 : i32, i32, i32, i32
  }
  func.func @transform_1(%arg0: i32, %arg1: i32, %arg2: i32, %arg3: i32) -> (i32, i32, i32, i32) {
    %c0_i32 = arith.constant 0 : i32
    %c0_i32_0 = arith.constant 0 : i32
    return %arg0, %arg2, %arg3, %c0_i32 : i32, i32, i32, i32
  }
  func.func @transform_2(%arg0: i32, %arg1: i32, %arg2: i32, %arg3: i32) -> (i32, i32, i32, i32) {
    %c0_i32 = arith.constant 0 : i32
    %c0_i32_0 = arith.constant 0 : i32
    return %arg0, %arg2, %arg3, %c0_i32 : i32, i32, i32, i32
  }
  func.func @transform_3(%arg0: i32, %arg1: i32, %arg2: i32, %arg3: i32) -> (i32, i32, i32) {
    %c0_i32 = arith.constant 0 : i32
    %c0_i32_0 = arith.constant 0 : i32
    return %arg0, %c0_i32, %arg3 : i32, i32, i32
  }
  func.func @transform_4(%arg0: i32, %arg1: i32, %arg2: i32, %arg3: i32) -> (i32, i32, i32) {
    %c0_i32 = arith.constant 0 : i32
    %c0_i32_0 = arith.constant 0 : i32
    return %arg0, %arg1, %c0_i32 : i32, i32, i32
  }
  func.func @transform_5(%arg0: i32, %arg1: i32, %arg2: i32, %arg3: i32) -> (i32, i32) {
    %c0_i32 = arith.constant 0 : i32
    %c0_i32_0 = arith.constant 0 : i32
    return %arg2, %c0_i32 : i32, i32
  }
  func.func @transform_6(%arg0: i32, %arg1: i32, %arg2: i32, %arg3: i32) -> (i32, i32) {
    %c0_i32 = arith.constant 0 : i32
    %c0_i32_0 = arith.constant 0 : i32
    %c0_i32_1 = arith.constant 0 : i32
    return %c0_i32, %c0_i32_0 : i32, i32
  }
  func.func @transform_7(%arg0: i32, %arg1: i32, %arg2: i32, %arg3: i32) -> (i32, i32, i32) {
    %c0_i32 = arith.constant 0 : i32
    %c0_i32_0 = arith.constant 0 : i32
    return %arg0, %arg1, %c0_i32 : i32, i32, i32
  }
}

module attributes {stable_mosaic.version = 11 : i64} {
  func.func @_ln_mlp_residual_kernel(%arg0: i32, %arg1: i32, %arg2: memref<16x32xbf16, #tpu.memory_space<vmem>>, %arg3: memref<1x32xf32, #tpu.memory_space<vmem>>, %arg4: memref<1x32xf32, #tpu.memory_space<vmem>>, %arg5: memref<32x128xbf16, #tpu.memory_space<vmem>>, %arg6: memref<1x128xf32, #tpu.memory_space<vmem>>, %arg7: memref<128x32xbf16, #tpu.memory_space<vmem>>, %arg8: memref<1x32xf32, #tpu.memory_space<vmem>>, %arg9: memref<16x32xbf16, #tpu.memory_space<vmem>>, %arg10: memref<16x32xbf16, #tpu.memory_space<vmem>>, %arg11: memref<16x32xf32, #tpu.memory_space<vmem>>) attributes {dimension_semantics = [#tpu.dimension_semantics<parallel>, #tpu.dimension_semantics<arbitrary>], iteration_bounds = array<i64: 1, 1>, scalar_prefetch = 0 : i64, scratch_operands = 2 : i64, tpu.core_type = #tpu.core_type<tc>, window_params = [{transform_indices = @transform_0, window_bounds = array<i64: 16, 32>}, {pipeline_mode = #tpu.pipeline_mode<synchronous>, transform_indices = @transform_1, window_bounds = array<i64: 1, 32>}, {pipeline_mode = #tpu.pipeline_mode<synchronous>, transform_indices = @transform_2, window_bounds = array<i64: 1, 32>}, {transform_indices = @transform_3, window_bounds = array<i64: 32, 128>}, {transform_indices = @transform_4, window_bounds = array<i64: 1, 128>}, {transform_indices = @transform_5, window_bounds = array<i64: 128, 32>}, {pipeline_mode = #tpu.pipeline_mode<synchronous>, transform_indices = @transform_6, window_bounds = array<i64: 1, 32>}, {transform_indices = @transform_7, window_bounds = array<i64: 16, 32>}]} {
    %c0_i32 = arith.constant 0 : i32
    %0 = arith.cmpi eq, %arg1, %c0_i32 : i32
    %1 = arith.extui %0 : i1 to i32
    %c0_i32_0 = arith.constant 0 : i32
    %2 = arith.cmpi ne, %1, %c0_i32_0 : i32
    scf.if %2 {
      %c0_19 = arith.constant 0 : index
      %c0_20 = arith.constant 0 : index
      %31 = vector.load %arg2[%c0_19, %c0_20] : memref<16x32xbf16, #tpu.memory_space<vmem>>, vector<16x32xbf16>
      %32 = arith.extf %31 : vector<16x32xbf16> to vector<16x32xf32>
      %c0_21 = arith.constant 0 : index
      %c0_22 = arith.constant 0 : index
      %33 = vector.load %arg3[%c0_21, %c0_22] : memref<1x32xf32, #tpu.memory_space<vmem>>, vector<1x32xf32>
      %c0_23 = arith.constant 0 : index
      %c0_24 = arith.constant 0 : index
      %34 = vector.load %arg4[%c0_23, %c0_24] : memref<1x32xf32, #tpu.memory_space<vmem>>, vector<1x32xf32>
      %cst_25 = arith.constant dense<0.000000e+00> : vector<16xf32>
      %35 = vector.multi_reduction <add>, %32, %cst_25 [1] : vector<16x32xf32> to vector<16xf32>
      %36 = vector.shape_cast %35 : vector<16xf32> to vector<16x1xf32>
      %cst_26 = arith.constant 3.200000e+01 : f32
      %37 = vector.broadcast %cst_26 : f32 to vector<16x1xf32>
      %38 = arith.divf %36, %37 : vector<16x1xf32>
      %39 = vector.broadcast %38 : vector<16x1xf32> to vector<16x32xf32>
      %40 = arith.subf %32, %39 : vector<16x32xf32>
      %41 = arith.mulf %40, %40 : vector<16x32xf32>
      %cst_27 = arith.constant dense<0.000000e+00> : vector<16xf32>
      %42 = vector.multi_reduction <add>, %41, %cst_27 [1] : vector<16x32xf32> to vector<16xf32>
      %43 = vector.shape_cast %42 : vector<16xf32> to vector<16x1xf32>
      %cst_28 = arith.constant 3.200000e+01 : f32
      %44 = vector.broadcast %cst_28 : f32 to vector<16x1xf32>
      %45 = arith.divf %43, %44 : vector<16x1xf32>
      %46 = vector.broadcast %38 : vector<16x1xf32> to vector<16x32xf32>
      %47 = arith.subf %32, %46 : vector<16x32xf32>
      %cst_29 = arith.constant 9.99999974E-6 : f32
      %48 = vector.broadcast %cst_29 : f32 to vector<16x1xf32>
      %49 = arith.addf %45, %48 : vector<16x1xf32>
      %50 = math.rsqrt %49 : vector<16x1xf32>
      %51 = vector.broadcast %50 : vector<16x1xf32> to vector<16x32xf32>
      %52 = arith.mulf %47, %51 : vector<16x32xf32>
      %53 = vector.broadcast %33 : vector<1x32xf32> to vector<16x32xf32>
      %54 = arith.mulf %52, %53 : vector<16x32xf32>
      %55 = vector.broadcast %34 : vector<1x32xf32> to vector<16x32xf32>
      %56 = arith.addf %54, %55 : vector<16x32xf32>
      %57 = arith.truncf %56 : vector<16x32xf32> to vector<16x32xbf16>
      %c0_30 = arith.constant 0 : index
      %c0_31 = arith.constant 0 : index
      %58 = vector.load %arg10[%c0_30, %c0_31] : memref<16x32xbf16, #tpu.memory_space<vmem>>, vector<16x32xbf16>
      tpu.vector_store %arg10[%c0_30, %c0_31], %57 {strides = array<i32>} : memref<16x32xbf16, #tpu.memory_space<vmem>>, vector<16x32xbf16>,
      %cst_32 = arith.constant 0.000000e+00 : f32
      %59 = vector.broadcast %cst_32 : f32 to vector<16x32xf32>
      %c0_33 = arith.constant 0 : index
      %c0_34 = arith.constant 0 : index
      %60 = vector.load %arg11[%c0_33, %c0_34] : memref<16x32xf32, #tpu.memory_space<vmem>>, vector<16x32xf32>
      tpu.vector_store %arg11[%c0_33, %c0_34], %59 {strides = array<i32>} : memref<16x32xf32, #tpu.memory_space<vmem>>, vector<16x32xf32>,
    } else {
    }
    %c0 = arith.constant 0 : index
    %c0_1 = arith.constant 0 : index
    %3 = vector.load %arg10[%c0, %c0_1] : memref<16x32xbf16, #tpu.memory_space<vmem>>, vector<16x32xbf16>
    %c0_2 = arith.constant 0 : index
    %c0_3 = arith.constant 0 : index
    %4 = vector.load %arg5[%c0_2, %c0_3] : memref<32x128xbf16, #tpu.memory_space<vmem>>, vector<32x128xbf16>
    %cst = arith.constant dense<0.000000e+00> : vector<16x128xf32>
    %5 = tpu.matmul %3, %4, %cst {dimension_numbers = #tpu.dot_dimension_numbers<[1], [0], [0], [1], [0, 0, 1, 1], [], []>} : vector<16x32xbf16>, vector<32x128xbf16>, vector<16x128xf32> -> vector<16x128xf32>
    %c0_4 = arith.constant 0 : index
    %c0_5 = arith.constant 0 : index
    %6 = vector.load %arg6[%c0_4, %c0_5] : memref<1x128xf32, #tpu.memory_space<vmem>>, vector<1x128xf32>
    %7 = vector.broadcast %6 : vector<1x128xf32> to vector<16x128xf32>
    %8 = arith.addf %5, %7 : vector<16x128xf32>
    %cst_6 = arith.constant 5.000000e-01 : f32
    %9 = vector.broadcast %cst_6 : f32 to vector<16x128xf32>
    %10 = arith.mulf %9, %8 : vector<16x128xf32>
    %cst_7 = arith.constant 4.471500e-02 : f32
    %11 = vector.broadcast %cst_7 : f32 to vector<16x128xf32>
    %12 = arith.mulf %11, %8 : vector<16x128xf32>
    %13 = arith.mulf %12, %8 : vector<16x128xf32>
    %14 = arith.mulf %13, %8 : vector<16x128xf32>
    %15 = arith.addf %8, %14 : vector<16x128xf32>
    %cst_8 = arith.constant 0.797884583 : f32
    %16 = vector.broadcast %cst_8 : f32 to vector<16x128xf32>
    %17 = arith.mulf %16, %15 : vector<16x128xf32>
    %18 = math.tanh %17 : vector<16x128xf32>
    %cst_9 = arith.constant 1.000000e+00 : f32
    %19 = vector.broadcast %cst_9 : f32 to vector<16x128xf32>
    %20 = arith.addf %19, %18 : vector<16x128xf32>
    %21 = arith.mulf %10, %20 : vector<16x128xf32>
    %c0_10 = arith.constant 0 : index
    %c0_11 = arith.constant 0 : index
    %22 = vector.load %arg11[%c0_10, %c0_11] : memref<16x32xf32, #tpu.memory_space<vmem>>, vector<16x32xf32>
    %23 = arith.truncf %21 : vector<16x128xf32> to vector<16x128xbf16>
    %c0_12 = arith.constant 0 : index
    %c0_13 = arith.constant 0 : index
    %24 = vector.load %arg7[%c0_12, %c0_13] : memref<128x32xbf16, #tpu.memory_space<vmem>>, vector<128x32xbf16>
    %cst_14 = arith.constant dense<0.000000e+00> : vector<16x32xf32>
    %25 = tpu.matmul %23, %24, %cst_14 {dimension_numbers = #tpu.dot_dimension_numbers<[1], [0], [0], [1], [0, 0, 1, 1], [], []>} : vector<16x128xbf16>, vector<128x32xbf16>, vector<16x32xf32> -> vector<16x32xf32>
    %26 = arith.addf %22, %25 : vector<16x32xf32>
    %c0_15 = arith.constant 0 : index
    %c0_16 = arith.constant 0 : index
    %27 = vector.load %arg11[%c0_15, %c0_16] : memref<16x32xf32, #tpu.memory_space<vmem>>, vector<16x32xf32>
    tpu.vector_store %arg11[%c0_15, %c0_16], %26 {strides = array<i32>} : memref<16x32xf32, #tpu.memory_space<vmem>>, vector<16x32xf32>,
    %c0_i32_17 = arith.constant 0 : i32
    %28 = arith.cmpi eq, %arg1, %c0_i32_17 : i32
    %29 = arith.extui %28 : i1 to i32
    %c0_i32_18 = arith.constant 0 : i32
    %30 = arith.cmpi ne, %29, %c0_i32_18 : i32
    scf.if %30 {
      %c0_19 = arith.constant 0 : index
      %c0_20 = arith.constant 0 : index
      %31 = vector.load %arg2[%c0_19, %c0_20] : memref<16x32xbf16, #tpu.memory_space<vmem>>, vector<16x32xbf16>
      %32 = arith.extf %31 : vector<16x32xbf16> to vector<16x32xf32>
      %c0_21 = arith.constant 0 : index
      %c0_22 = arith.constant 0 : index
      %33 = vector.load %arg11[%c0_21, %c0_22] : memref<16x32xf32, #tpu.memory_space<vmem>>, vector<16x32xf32>
      %34 = arith.addf %32, %33 : vector<16x32xf32>
      %c0_23 = arith.constant 0 : index
      %c0_24 = arith.constant 0 : index
      %35 = vector.load %arg8[%c0_23, %c0_24] : memref<1x32xf32, #tpu.memory_space<vmem>>, vector<1x32xf32>
      %36 = vector.broadcast %35 : vector<1x32xf32> to vector<16x32xf32>
      %37 = arith.addf %34, %36 : vector<16x32xf32>
      %38 = arith.truncf %37 : vector<16x32xf32> to vector<16x32xbf16>
      %c0_25 = arith.constant 0 : index
      %c0_26 = arith.constant 0 : index
      %39 = vector.load %arg9[%c0_25, %c0_26] : memref<16x32xbf16, #tpu.memory_space<vmem>>, vector<16x32xbf16>
      tpu.vector_store %arg9[%c0_25, %c0_26], %38 {strides = array<i32>} : memref<16x32xbf16, #tpu.memory_space<vmem>>, vector<16x32xbf16>,
    } else {
    }
    return
  }
  func.func @transform_0(%arg0: i32, %arg1: i32) -> (i32, i32) {
    %c0_i32 = arith.constant 0 : i32
    %c0_i32_0 = arith.constant 0 : i32
    return %arg0, %c0_i32 : i32, i32
  }
  func.func @transform_1(%arg0: i32, %arg1: i32) -> (i32, i32) {
    %c0_i32 = arith.constant 0 : i32
    %c0_i32_0 = arith.constant 0 : i32
    %c0_i32_1 = arith.constant 0 : i32
    return %c0_i32, %c0_i32_0 : i32, i32
  }
  func.func @transform_2(%arg0: i32, %arg1: i32) -> (i32, i32) {
    %c0_i32 = arith.constant 0 : i32
    %c0_i32_0 = arith.constant 0 : i32
    %c0_i32_1 = arith.constant 0 : i32
    return %c0_i32, %c0_i32_0 : i32, i32
  }
  func.func @transform_3(%arg0: i32, %arg1: i32) -> (i32, i32) {
    %c0_i32 = arith.constant 0 : i32
    %c0_i32_0 = arith.constant 0 : i32
    return %c0_i32, %arg1 : i32, i32
  }
  func.func @transform_4(%arg0: i32, %arg1: i32) -> (i32, i32) {
    %c0_i32 = arith.constant 0 : i32
    %c0_i32_0 = arith.constant 0 : i32
    return %c0_i32, %arg1 : i32, i32
  }
  func.func @transform_5(%arg0: i32, %arg1: i32) -> (i32, i32) {
    %c0_i32 = arith.constant 0 : i32
    %c0_i32_0 = arith.constant 0 : i32
    return %arg1, %c0_i32 : i32, i32
  }
  func.func @transform_6(%arg0: i32, %arg1: i32) -> (i32, i32) {
    %c0_i32 = arith.constant 0 : i32
    %c0_i32_0 = arith.constant 0 : i32
    %c0_i32_1 = arith.constant 0 : i32
    return %c0_i32, %c0_i32_0 : i32, i32
  }
  func.func @transform_7(%arg0: i32, %arg1: i32) -> (i32, i32) {
    %c0_i32 = arith.constant 0 : i32
    %c0_i32_0 = arith.constant 0 : i32
    return %arg0, %c0_i32 : i32, i32
  }
}

module attributes {stable_mosaic.version = 11 : i64} {
  func.func @_ln_class_head_kernel(%arg0: i32, %arg1: memref<2x32xbf16, #tpu.memory_space<vmem>>, %arg2: memref<1x32xf32, #tpu.memory_space<vmem>>, %arg3: memref<1x32xf32, #tpu.memory_space<vmem>>, %arg4: memref<32x128xbf16, #tpu.memory_space<vmem>>, %arg5: memref<2x128xf32, #tpu.memory_space<vmem>>) attributes {dimension_semantics = [#tpu.dimension_semantics<arbitrary>], iteration_bounds = array<i64: 1>, scalar_prefetch = 0 : i64, scratch_operands = 0 : i64, tpu.core_type = #tpu.core_type<tc>, window_params = [{pipeline_mode = #tpu.pipeline_mode<synchronous>, transform_indices = @transform_0, window_bounds = array<i64: 2, 32>}, {pipeline_mode = #tpu.pipeline_mode<synchronous>, transform_indices = @transform_1, window_bounds = array<i64: 1, 32>}, {pipeline_mode = #tpu.pipeline_mode<synchronous>, transform_indices = @transform_2, window_bounds = array<i64: 1, 32>}, {pipeline_mode = #tpu.pipeline_mode<synchronous>, transform_indices = @transform_3, window_bounds = array<i64: 32, 128>}, {pipeline_mode = #tpu.pipeline_mode<synchronous>, transform_indices = @transform_4, window_bounds = array<i64: 2, 128>}]} {
    %c0 = arith.constant 0 : index
    %c0_0 = arith.constant 0 : index
    %0 = vector.load %arg1[%c0, %c0_0] : memref<2x32xbf16, #tpu.memory_space<vmem>>, vector<2x32xbf16>
    %1 = arith.extf %0 : vector<2x32xbf16> to vector<2x32xf32>
    %c0_1 = arith.constant 0 : index
    %c0_2 = arith.constant 0 : index
    %2 = vector.load %arg2[%c0_1, %c0_2] : memref<1x32xf32, #tpu.memory_space<vmem>>, vector<1x32xf32>
    %c0_3 = arith.constant 0 : index
    %c0_4 = arith.constant 0 : index
    %3 = vector.load %arg3[%c0_3, %c0_4] : memref<1x32xf32, #tpu.memory_space<vmem>>, vector<1x32xf32>
    %cst = arith.constant dense<0.000000e+00> : vector<2xf32>
    %4 = vector.multi_reduction <add>, %1, %cst [1] : vector<2x32xf32> to vector<2xf32>
    %5 = vector.shape_cast %4 : vector<2xf32> to vector<2x1xf32>
    %cst_5 = arith.constant 3.200000e+01 : f32
    %6 = vector.broadcast %cst_5 : f32 to vector<2x1xf32>
    %7 = arith.divf %5, %6 : vector<2x1xf32>
    %8 = vector.broadcast %7 : vector<2x1xf32> to vector<2x32xf32>
    %9 = arith.subf %1, %8 : vector<2x32xf32>
    %10 = arith.mulf %9, %9 : vector<2x32xf32>
    %cst_6 = arith.constant dense<0.000000e+00> : vector<2xf32>
    %11 = vector.multi_reduction <add>, %10, %cst_6 [1] : vector<2x32xf32> to vector<2xf32>
    %12 = vector.shape_cast %11 : vector<2xf32> to vector<2x1xf32>
    %cst_7 = arith.constant 3.200000e+01 : f32
    %13 = vector.broadcast %cst_7 : f32 to vector<2x1xf32>
    %14 = arith.divf %12, %13 : vector<2x1xf32>
    %15 = vector.broadcast %7 : vector<2x1xf32> to vector<2x32xf32>
    %16 = arith.subf %1, %15 : vector<2x32xf32>
    %cst_8 = arith.constant 9.99999974E-6 : f32
    %17 = vector.broadcast %cst_8 : f32 to vector<2x1xf32>
    %18 = arith.addf %14, %17 : vector<2x1xf32>
    %19 = math.rsqrt %18 : vector<2x1xf32>
    %20 = vector.broadcast %19 : vector<2x1xf32> to vector<2x32xf32>
    %21 = arith.mulf %16, %20 : vector<2x32xf32>
    %22 = vector.broadcast %2 : vector<1x32xf32> to vector<2x32xf32>
    %23 = arith.mulf %21, %22 : vector<2x32xf32>
    %24 = vector.broadcast %3 : vector<1x32xf32> to vector<2x32xf32>
    %25 = arith.addf %23, %24 : vector<2x32xf32>
    %26 = arith.truncf %25 : vector<2x32xf32> to vector<2x32xbf16>
    %c0_9 = arith.constant 0 : index
    %c0_10 = arith.constant 0 : index
    %27 = vector.load %arg4[%c0_9, %c0_10] : memref<32x128xbf16, #tpu.memory_space<vmem>>, vector<32x128xbf16>
    %cst_11 = arith.constant dense<0.000000e+00> : vector<2x128xf32>
    %28 = tpu.matmul %26, %27, %cst_11 {dimension_numbers = #tpu.dot_dimension_numbers<[1], [0], [0], [1], [0, 0, 1, 1], [], []>} : vector<2x32xbf16>, vector<32x128xbf16>, vector<2x128xf32> -> vector<2x128xf32>
    %c0_12 = arith.constant 0 : index
    %c0_13 = arith.constant 0 : index
    %29 = vector.load %arg5[%c0_12, %c0_13] : memref<2x128xf32, #tpu.memory_space<vmem>>, vector<2x128xf32>
    tpu.vector_store %arg5[%c0_12, %c0_13], %28 {strides = array<i32>} : memref<2x128xf32, #tpu.memory_space<vmem>>, vector<2x128xf32>,
    return
  }
  func.func @transform_0(%arg0: i32) -> (i32, i32) {
    %c0_i32 = arith.constant 0 : i32
    %c0_i32_0 = arith.constant 0 : i32
    %c0_i32_1 = arith.constant 0 : i32
    return %c0_i32, %c0_i32_0 : i32, i32
  }
  func.func @transform_1(%arg0: i32) -> (i32, i32) {
    %c0_i32 = arith.constant 0 : i32
    %c0_i32_0 = arith.constant 0 : i32
    %c0_i32_1 = arith.constant 0 : i32
    return %c0_i32, %c0_i32_0 : i32, i32
  }
  func.func @transform_2(%arg0: i32) -> (i32, i32) {
    %c0_i32 = arith.constant 0 : i32
    %c0_i32_0 = arith.constant 0 : i32
    %c0_i32_1 = arith.constant 0 : i32
    return %c0_i32, %c0_i32_0 : i32, i32
  }
  func.func @transform_3(%arg0: i32) -> (i32, i32) {
    %c0_i32 = arith.constant 0 : i32
    %c0_i32_0 = arith.constant 0 : i32
    %c0_i32_1 = arith.constant 0 : i32
    return %c0_i32, %c0_i32_0 : i32, i32
  }
  func.func @transform_4(%arg0: i32) -> (i32, i32) {
    %c0_i32 = arith.constant 0 : i32
    %c0_i32_0 = arith.constant 0 : i32
    %c0_i32_1 = arith.constant 0 : i32
    return %c0_i32, %c0_i32_0 : i32, i32
  }
}

</mosaic_0001>

<bundles_post_ra>
// kernel: paraphrase_gpt_forward.7
= control target key start
LH: loop header
LB: loop body
LE: loop exit
PB: predicated region body
PF: predicated region fallthrough
CT: control target
= control target key end

     0   :  { %vm27_vm0 = vcmask 261120   ;;  %v187_v15 = vmov 0.0   ;;  %vm188_vm1 = vmmov 0   ;;  %vm147_vm2 = vcmask 781312   ;;  %s248_s0 = inlined_call_operand.vmem [shape: bf16[16,32], index: 0, kind: input, shape index: {}]   ;;  %s249_s3 = inlined_call_operand.vmem [shape: bf16[32,96], index: 3, kind: input, shape index: {}]   ;;  %s250_s1 = inlined_call_operand.vmem [shape: f32[1,32], index: 1, kind: input, shape index: {}]   ;;  %s251_s2 = inlined_call_operand.vmem [shape: f32[1,32], index: 2, kind: input, shape index: {}]   ;;  %s252_s4 = inlined_call_operand.vmem [shape: f32[1,96], index: 4, kind: input, shape index: {}]   ;;  %s253_s5 = inlined_call_operand.vmem [shape: bf16[16,96], index: 5, kind: output, shape index: {}]  }
   0x1   :  { %v165_v0 = vld [vmem:[%s248_s0] sm:$0xff]   ;;  %171 = vmatprep.subr.bf16.mxu0 %v187_v15  ;;  %v181_v16 = vld [vmem:[%s249_s3 + $0x8] sm:$0xff]   ;;  %175 = vmatprep.mubr.msk.bf16.mxu0 %vm188_vm1, %v187_v15 }
   0x2   :  { %v166_v1 = vunpack.c.l.bf16 %v165_v0  ;;  %v167_v2 = vunpack.c.h.bf16 %v165_v0  ;;  %172 = vmatpush3.bf16.msra.mxu0 %v181_v16  ;;  %v182_v17 = vld [vmem:[%s249_s3] sm:$0xff]  }
   0x3   :  { %173 = vmatprep.subr.bf16.mxu0 %v187_v15  ;;  %v154_v26 = vld [vmem:[%s250_s1] ss:$0 sm:$0xff] }
   0x4   :  { %v28_v3 = vsel %vm27_vm0, %v166_v1, 0.0  ;;  %v31_v4 = vsel %vm27_vm0, %v167_v2, 0.0  ;;  %v155_v30 = vld [vmem:[%s251_s2] ss:$0 sm:$0xff] }
   0x5   :  { %29 = vadd.xlane.f32.xlu0 %v28_v3  ;;  %v156_v35 = vld [vmem:[%s252_s4] ss:$0 sm:$0xff] }
   0x6   :  { %174 = vmatpush3.bf16.msra.mxu0 %v182_v17 }
   0x9   :  { %32 = vadd.xlane.f32.xlu0 %v31_v4 }
  0x8e   :  { %v30_v5 = vpop.xlane.xlu0 %29 }
  0x8f   :  { %v35_v6 = vmul.f32 0.03125, %v30_v5 }
  0x91   :  { %v37_v7 = vsub.f32 %v166_v1, %v35_v6 }
  0x92   :  { %v33_v8 = vpop.xlane.xlu0 %32 }
  0x93   :  { %v36_v9 = vmul.f32 0.03125, %v33_v8  ;;  %v39_v10 = vmul.f32 %v37_v7, %v37_v7 }
  0x95   :  { %v38_v11 = vsub.f32 %v167_v2, %v36_v9  ;;  %v41_v12 = vsel %vm27_vm0, %v39_v10, 0.0 }
  0x96   :  { %42 = vadd.xlane.f32.xlu1 %v41_v12 }
  0x97   :  { %v40_v13 = vmul.f32 %v38_v11, %v38_v11 }
  0x99   :  { %v44_v14 = vsel %vm27_vm0, %v40_v13, 0.0 }
  0x9a   :  { %45 = vadd.xlane.f32.xlu1 %v44_v14 }
 0x11f   :  { %v43_v18 = vpop.xlane.xlu1 %42 }
 0x120   :  { %v47_v19 = vmul.f32 0.03125, %v43_v18 }
 0x122   :  { %v49_v20 = vadd.f32 1e-05, %v47_v19 }
 0x123   :  { %v46_v21 = vpop.xlane.xlu1 %45 }
 0x124   :  { %183 = vrsqrt.f32 %v49_v20  ;;  %v48_v22 = vmul.f32 0.03125, %v46_v21 }
 0x126   :  { %v50_v23 = vadd.f32 1e-05, %v48_v22 }
 0x128   :  { %185 = vrsqrt.f32 %v50_v23 }
 0x131   :  { %v184_v24 = vpop.eup %183 }
 0x132   :  { %v53_v25 = vmul.f32 %v184_v24, %v37_v7 }
 0x134   :  { %v61_v29 = vmul.f32 %v154_v26, %v53_v25 }
 0x135   :  { %v186_v27 = vpop.eup %185 }
 0x136   :  { %v54_v28 = vmul.f32 %v186_v27, %v38_v11  ;;  %v69_v32 = vadd.f32 %v155_v30, %v61_v29 }
 0x138   :  { %v62_v31 = vmul.f32 %v154_v26, %v54_v28 }
 0x13a   :  { %v70_v33 = vadd.f32 %v155_v30, %v62_v31 }
 0x13c   :  { %v71_v34 = vpack.c.bf16 %v70_v33, %v69_v32 }
 0x13e   :  { %176 = vmatmul.mubr.msk.bf16.vlgmr.msra.gmra.mxu0 %vm27_vm0, %v71_v34 }
 0x1fe   :  { %v132_v36 = vpop.f32.mrf.mxu0 }
 0x1ff   :  { %v133_v37 = vadd.f32 %v156_v35, %v132_v36 }
 0x200   :  { %v177_v38 = vpop.f32.mrf.mxu0 }
 0x201   :  { %v162_v39 = vpack.c.bf16 %v133_v37, %v133_v37 }
 0x202   :  { %v135_v40 = vpop.f32.mrf.mxu0 }
 0x203   :  { %148 = vst.msk [vmem:[%s253_s5] sm:$0xf] %vm147_vm2, %v162_v39  ;;  %v136_v41 = vadd.f32 %v156_v35, %v135_v40 }
 0x204   :  { %v178_v42 = vpop.f32.mrf.mxu0 }
 0x205   :  { %v163_v43 = vpack.c.bf16 %v136_v41, %v136_v41 }
 0x207   :  { %149 = vst.msk [vmem:[%s253_s5 + $0x4] sm:$0xf] %vm147_vm2, %v163_v43 }

// kernel: paraphrase_gpt_forward.8
= control target key start
LH: loop header
LB: loop body
LE: loop exit
PB: predicated region body
PF: predicated region fallthrough
CT: control target
= control target key end

     0   :  { %s1110_s24 = smov 0   ;;  %s1112_s25 = smov 0   ;;  %s1232_s0 = inlined_call_operand.vmem [shape: bf16[2,2,8,16], index: 0, kind: input, shape index: {}]   ;;  %s1233_s1 = inlined_call_operand.vmem [shape: bf16[2,2,8,16], index: 1, kind: input, shape index: {}]   ;;  %s1234_s2 = inlined_call_operand.vmem [shape: bf16[2,2,8,16], index: 2, kind: input, shape index: {}]   ;;  %s1235_s3 = inlined_call_operand.vmem [shape: f32[2,1,8], index: 3, kind: input, shape index: {}]   ;;  %s1236_s4 = inlined_call_operand.vmem [shape: bf16[2,8,32], index: 4, kind: input, shape index: {}]   ;;  %s1237_s5 = inlined_call_operand.vmem [shape: bf16[32,32], index: 5, kind: input, shape index: {}]   ;;  %s1238_s6 = inlined_call_operand.vmem [shape: f32[1,32], index: 6, kind: input, shape index: {}]   ;;  %s1239_s7 = inlined_call_operand.vmem [shape: bf16[2,8,32], index: 7, kind: output, shape index: {}]  }
   0x1   :  { %1240 = sst [smem:[#allocation8_spill]] %s1236_s4  ;;  %s1114_s26 = smov 0  }
   0x2   :  { %s1116_s27 = smov 0   ;;  %s1118_s28 = smov 0  }
   0x3 LB: > { %s35_s29 = sadd.s32 1, %s1055_s26  ;;  %s43_s30 = sadd.s32 1, %s1059_s27  ;;  %s1063_s28 = sphi %s1118_s28, %s17_s28   ;;  %s1059_s27 = sphi %s1116_s27, %s1250_s27   ;;  %s1055_s26 = sphi %s1114_s26, %s1249_s26   ;;  %s1051_s25 = sphi %s1112_s25, %s1248_s25   ;;  %s1047_s24 = sphi %s1110_s24, %s1247_s24  }
   0x4   : > { %p37_p0 = scmp.ge.s32.totalorder %s35_s29, 2  ;;  %p925_p1 = scmp.ge.s32.totalorder %s1063_s28, 1 }
   0x5   : > { %p353_p2 = scmp.lt.s32.totalorder %s1063_s28, 5 }
   0x6   : > { %s1252_s29 = smov (%p37_p0, %s35_s29), 0  ;;  %s1254_s30 = smov (!%p37_p0, %s43_s30), %s1059_s27 }
   0x7   : > { %1241 = sst [smem:[#allocation6_spill]] %s1252_s29  ;;  %p354_p3 = pnand %p925_p1, %p353_p2 }
   0x8   : > { %p45_p4 = scmp.ge.s32.totalorder %s1254_s30, 2  ;;  %p433_p5 = scmp.lt.s32.totalorder (!%p354_p3), %s1051_s25, 1 }
   0x9   : > { %357 = sbr.rel (%p354_p3) target bundleno = 1013 (0x3f5), region = 48  ;;  %p435_p6 = scmp.lt.s32.totalorder (!%p354_p3), %s1047_s24, 1 }
   0xa   : > { %s1256_s30 = smov (%p45_p4, %s1254_s30), 0  ;;  %s933_s8 = sshll.u32 (!%p354_p3), %s1047_s24, 1 }
   0xb   : > { %1242 = sst [smem:[#allocation7_spill]] %s1256_s30  ;;  %p493_p7 = scmp.eq.s32.totalorder (!%p354_p3), %s1047_s24, 0 }
   0xc   : > { %s1243_s4 = sld [smem:[#allocation8_spill]] (!%p354_p3)  ;;  %p480_p8 = scmp.lt.s32.totalorder (!%p354_p3), %s933_s8, 3 }
   0xe   : > { %s1258_s25 = smov (!%p433_p5, %s1051_s25), 1  ;;  %s1260_s8 = smov (!%p480_p8, %s933_s8), 3  ;;  %vm499_vm0 = vcmask (%p493_p7), 261120   ;;  %v1065_v0 = vmov (%p493_p7), 0.0  }
   0xf   : > { %s436_s9 = scalar_select %p435_p6, %s1047_s24, 1  ;;  %500 = vst.msk [vmem:[#allocation5] sm:$0xff] (%p493_p7), %vm499_vm0, %v1065_v0 }
  0x10   : > { %s926_s10 = sshll.u32 %s1258_s25, 1  ;;  %s932_s15 = sshll.u32 %s1258_s25, 2 }
  0x11   : > { %s441_s14 = sadd.s32 %s926_s10, %s436_s9  ;;  %s1176_s18 = scalar_lea.vmem %s1239_s7, %s932_s15 }
  0x12   : > { %s1154_s16 = sshll.u32 %s441_s14, 2  ;;  %s1159_s19 = scalar_lea.vmem %s1243_s4, %s932_s15 }
  0x13   : > { %s443_s22 = scalar_lea.vmem %s1232_s0, %s1154_s16  ;;  %s454_s11 = scalar_lea.vmem %s1233_s1, %s1154_s16 }
  0x14   : > { %s465_s12 = scalar_lea.vmem %s1234_s2, %s1154_s16  ;;  %s934_s13 = sshll.u32 %s1260_s8, 2 }
  0x15   : > { %s1181_s20 = scalar_lea.vmem %s1237_s5, %s934_s13  ;;  %498 = sbr.rel (!%p493_p7) target bundleno = 26 (0x1a), region = 52 }
  0x1a PF: > { %vm507_vm1 = vcmask 130048   ;;  %v510_v1 = vld [vmem:[%s454_s11] sm:$0xf]  ;;  %v1066_v2 = vmov 0.0   ;;  %vm1067_vm2 = vmmov 0   ;;  %v1068_v5 = vmov 0   ;;  %s1244_s30 = scalar_lea.vmem %s1235_s3, %s1258_s25 }
  0x1b   : > { %953 = vmatprep.subr.bf16.mxu0 %v1066_v2  ;;  %508 = vst.msk [vmem:[#allocation4] sm:$0xff] %vm507_vm1, %v1066_v2  ;;  %v516_v3 = vsel %vm507_vm1, %v510_v1, 0  ;;  %955 = vmatprep.mubr.msk.bf16.mxu0 %vm1067_vm2, %v1066_v2  ;;  %v509_v4 = vld [vmem:[%s443_s22] sm:$0xf]  ;;  %v559_v6 = vlaneseq  ;;  %vm580_vm7 = vcmask 64512   ;;  %vm504_vm8 = vcmask 7168  }
  0x1c   : > { %954 = vmatpush3.bf16.xpose.msra.mxu0 %v516_v3  ;;  %959 = vmatprep.subr.bf16.mxu1 %v1066_v2  ;;  %v569_v7 = vld [vmem:[%s1244_s30] sm:$0x1]  ;;  %v1069_v18 = vmov -inf   ;;  %506 = vst.msk [vmem:[#allocation3] sm:$0xff] %vm504_vm8, %v1066_v2  ;;  %vm616_vm9 = vcmask 1043456   ;;  %p731_p9 = scmp.eq.s32.totalorder %s1047_s24, 1 }
  0x1d   : > { %961 = vmatprep.mubr.msk.bf16.mxu1 %vm1067_vm2, %v1066_v2  ;;  %1016 = vset.pattern.permute.xlu0 %v1068_v5  ;;  %v560_v8 = vshrl.u32 %v559_v6, 7  ;;  %vm570_vm3 = vcmp.gt.f32.partialorder %v569_v7, 0.5  ;;  %v565_v11 = vand.u32 127, %v559_v6  ;;  %505 = vst.msk [vmem:[#allocation2] sm:$0xff] %vm504_vm8, %v1069_v18  ;;  %v612_v24 = vld [vmem:[%s465_s12] sm:$0xf] }
  0x1e   : > { %1017 = vset.pattern.permute.xlu1 %v1068_v5  ;;  %v571_v10 = vsel %vm570_vm3, 1, %v1068_v5  ;;  %v618_v25 = vsel %vm616_vm9, %v612_v24, 0  ;;  %v1018_v34 = vld [vmem:[%s1181_s20] sm:$0xff]   ;;  %v675_v53 = vld [vmem:[#allocation5] sm:$0xff]  ;;  %vm729_vm10 = vcmask 261120   ;;  %vm749_vm11 = vcmask (%p731_p9), 257024  }
  0x1f   : > { %v574_v9 = vsub.s32 0, %v560_v8  ;;  %vm568_vm4 = vcmp.le.s32.totalorder %v565_v11, %v560_v8  ;;  %960 = vmatpush3.bf16.msra.mxu1 %v618_v25  ;;  %v736_v59 = vld [vmem:[%s1159_s19] sm:$0xf] (%p731_p9) }
  0x20   : > { %965 = vmatprep.subr.bf16.mxu1 %v1066_v2  ;;  %v737_v61 = vunpack.c.l.bf16 (%p731_p9), %v736_v59  ;;  %v942_v62 = vld [vmem:[%s1238_s6] ss:$0 sm:$0xff] (%p731_p9) }
  0x21   : > { %v575_v12 = vrot.slane %v571_v10, %v574_v9 }
  0x22   : > { %v604_v41 = vld [vmem:[#allocation4] sm:$0xff] }
  0x23   : > { %956 = vmatmul.mubr.msk.bf16.vlgmr.msra.gmra.mxu0 %vm507_vm1, %v509_v4  ;;  %vm576_vm5 = vcmp.eq.s32.totalorder %v575_v12, 1  ;;  %v596_v35 = vld [vmem:[#allocation3] sm:$0xff] }
  0x24   : > { %vm577_vm6 = vmand %vm568_vm4, %vm576_vm5  ;;  %v579_v20 = vld [vmem:[#allocation2] sm:$0xff] }
  0xe3   : > { %v552_v13 = vpop.f32.mrf.mxu0 }
  0xe4   : > { %v578_v14 = vsel %vm577_vm6, %v552_v13, -1e+09 }
  0xe5   : > { %v957_v15 = vpop.f32.mrf.mxu0  ;;  %v581_v16 = vsel %vm580_vm7, %v578_v14, -inf }
  0xe6   : > { %582 = vmax.xlane.f32.xlu0 %v581_v16 }
  0xe7   : > { %v555_v17 = vpop.f32.mrf.mxu0 }
  0xe9   : > { %v958_v19 = vpop.f32.mrf.mxu0 }
 0x16f   : > { %v583_v21 = vpop.xlane.xlu0 %582 }
 0x170   : > { %v584_v22 = vmax.f32 %v579_v20, %v583_v21 }
 0x172   : > { %v585_v23 = vsub.f32 %v579_v20, %v584_v22  ;;  %662 = vst.msk [vmem:[#allocation2] sm:$0xff] %vm504_vm8, %v584_v22  ;;  %590 = vperm.xlu0 %1016, %v584_v22  }
 0x174   : > { %v586_v30 = vmul.f32 1.442695, %v585_v23 }
 0x1ed   : > { %v591_v26 = vpop.permute.xlu0 %590 }
 0x1ee   : > { %v593_v27 = vsub.f32 %v578_v14, %v591_v26 }
 0x1f0   : > { %v594_v28 = vmul.f32 1.442695, %v593_v27 }
 0x1f2   : > { %1019 = vpow2.f32 %v594_v28 }
 0x1f3   : > { %1021 = vpow2.f32 %v586_v30 }
 0x1ff   : > { %v1020_v29 = vpop.eup %1019 }
 0x200   : > { %v598_v31 = vsel %vm580_vm7, %v1020_v29, 0.0  ;;  %v611_v32 = vpack.c.bf16 %v1020_v29, %v1020_v29  ;;  %v1022_v33 = vpop.eup %1021 }
 0x201   : > { %599 = vadd.xlane.f32.xlu1 %v598_v31  ;;  %v597_v36 = vmul.f32 %v1022_v33, %v596_v35 }
 0x202   : > { %962 = vmatmul.mubr.msk.bf16.vlgmr.msra.gmra.mxu1 %vm580_vm7, %v611_v32 }
 0x203   : > { %967 = vmatprep.mubr.msk.bf16.mxu1 %vm1067_vm2, %v1066_v2  ;;  %966 = vmatpush3.bf16.msra.mxu1 %v1018_v34 }
 0x212   : > { %607 = vperm.xlu1 %1017, %v1022_v33  }
 0x28a   : > { %v600_v37 = vpop.xlane.xlu1 %599 }
 0x28b   : > { %v601_v38 = vadd.f32 %v600_v37, %v597_v36 }
 0x28d   : > { %603 = vst.msk [vmem:[#allocation3] sm:$0xff] %vm504_vm8, %v601_v38 }
 0x28e   : > { %v608_v42 = vpop.permute.xlu1 %607 }
 0x28f   : > { %v610_v43 = vmul.f32 %v608_v42, %v604_v41 }
 0x294   : > { %v667_v39 = vld [vmem:[#allocation3] sm:$0xff] }
 0x295   : > { %1023 = vrcp.f32 %v667_v39 }
 0x2a2   : > { %v1024_v40 = vpop.eup %1023 }
 0x2a3   : > { %671 = vperm.xlu1 %1017, %v1024_v40  }
 0x2c2   : > { %v654_v44 = vpop.f32.mrf.mxu1 }
 0x2c3   : > { %v660_v45 = vadd.f32 %v654_v44, %v610_v43 }
 0x2c4   : > { %v963_v46 = vpop.f32.mrf.mxu1 }
 0x2c5   : > { %661 = vst.msk [vmem:[#allocation4] sm:$0xff] %vm507_vm1, %v660_v45 }
 0x2c6   : > { %v657_v47 = vpop.f32.mrf.mxu1 }
 0x2c8   : > { %v964_v48 = vpop.f32.mrf.mxu1 }
 0x2cc   : > { %v666_v49 = vld [vmem:[#allocation4] sm:$0xff] }
 0x31e   : > { %v672_v50 = vpop.permute.xlu1 %671 }
 0x31f   : > { %v674_v51 = vmul.f32 %v672_v50, %v666_v49 }
 0x321   : > { %v676_v52 = vpack.c.bf16 %v674_v51, %v674_v51 }
 0x323   : > { %968 = vmatmul.mubr.msk.bf16.vlgmr.msra.gmra.mxu1 %vm507_vm1, %v676_v52 }
 0x3e3   : > { %v722_v54 = vpop.f32.mrf.mxu1 }
 0x3e4   : > { %v728_v55 = vadd.f32 %v722_v54, %v675_v53 }
 0x3e5   : > { %v969_v56 = vpop.f32.mrf.mxu1  ;;  %735 = sbr.rel (!%p731_p9) target bundleno = 1013 (0x3f5), region = 64 }
 0x3e6   : > { %730 = vst.msk [vmem:[#allocation5] sm:$0xff] %vm729_vm10, %v728_v55 }
 0x3e7   : > { %v725_v57 = vpop.f32.mrf.mxu1 }
 0x3e9   : > { %v970_v58 = vpop.f32.mrf.mxu1 }
 0x3ed   : > { %v738_v60 = vld [vmem:[#allocation5] sm:$0xff] }
 0x3ee   : > { %v739_v63 = vadd.f32 %v738_v60, %v737_v61 }
 0x3f0   : > { %v747_v0 = vadd.f32 %v942_v62, %v739_v63 }
 0x3f2   : > { %v748_v1 = vpack.c.bf16 %v747_v0, %v747_v0 }
 0x3f4   : > { %750 = vst.msk [vmem:[%s1176_s18] sm:$0xf] %vm749_vm11, %v748_v1 }
 0x3f5 PF: > { %s17_s28 = sadd.s32 1, %s1063_s28   ;;  %s1245_s16 = sld [smem:[#allocation6_spill]] }
 0x3f6   : > { %p14_p10 = scmp.ge.s32.totalorder %s17_s28, 6   ;;  %s1246_s19 = sld [smem:[#allocation7_spill]] }
 0x3f7   : > { %s1247_s24 = smov %s1055_s26  ;;  %s1248_s25 = smov %s1059_s27 }
 0x3f8   :  { %16 = sbr.rel (!%p14_p10) target bundleno = 3 (0x3), region = 109 }
 0x3fb   : > { %s1249_s26 = smov %s1245_s16 }
 0x3fc   : > { %s1250_s27 = smov %s1246_s19 }

// kernel: paraphrase_gpt_forward.9
= control target key start
LH: loop header
LB: loop body
LE: loop exit
PB: predicated region body
PF: predicated region fallthrough
CT: control target
= control target key end

     0   :  { %vm37_vm0 = vcmask 261120   ;;  %v427_v16 = vmov 0.0   ;;  %vm428_vm1 = vmmov 0   ;;  %vm89_vm2 = vcmask 257024   ;;  %s543_s0 = inlined_call_operand.vmem [shape: bf16[16,32], index: 0, kind: input, shape index: {}]   ;;  %s544_s3 = inlined_call_operand.vmem [shape: bf16[32,128], index: 3, kind: input, shape index: {}]   ;;  %s545_s1 = inlined_call_operand.vmem [shape: f32[1,32], index: 1, kind: input, shape index: {}]   ;;  %s546_s2 = inlined_call_operand.vmem [shape: f32[1,32], index: 2, kind: input, shape index: {}]   ;;  %s547_s5 = inlined_call_operand.vmem [shape: bf16[128,32], index: 5, kind: input, shape index: {}]   ;;  %s548_s4 = inlined_call_operand.vmem [shape: f32[1,128], index: 4, kind: input, shape index: {}]   ;;  %s549_s6 = inlined_call_operand.vmem [shape: f32[1,32], index: 6, kind: input, shape index: {}]   ;;  %s550_s7 = inlined_call_operand.vmem [shape: bf16[16,32], index: 7, kind: output, shape index: {}]  }
   0x1   :  { %v359_v0 = vld [vmem:[%s543_s0] sm:$0xff]   ;;  %v408_v15 = vld [vmem:[%s544_s3 + $0x8] sm:$0xff]   ;;  %378 = vmatprep.subr.bf16.mxu0 %v427_v16  ;;  %92 = vst.msk [vmem:[#allocation3] sm:$0xff] %vm37_vm0, %v427_v16  ;;  %93 = vst.msk [vmem:[#allocation3 + $0x8] sm:$0xff] %vm37_vm0, %v427_v16  ;;  %386 = vmatprep.subr.bf16.mxu1 %v427_v16 }
   0x2   :  { %v472_v1 = vunpack.c.l.bf16 %v359_v0  ;;  %v474_v2 = vunpack.c.h.bf16 %v359_v0  ;;  %379 = vmatpush3.bf16.msra.mxu0 %v408_v15  ;;  %v409_v17 = vld [vmem:[%s544_s3] sm:$0xff]   ;;  %382 = vmatprep.mubr.msk.bf16.mxu0 %vm428_vm1, %v427_v16  ;;  %v411_v37 = vld [vmem:[%s547_s5 + $0x38] sm:$0xff]   ;;  %v412_v38 = vld [vmem:[%s547_s5 + $0x30] sm:$0xff]  }
   0x3   :  { %380 = vmatprep.subr.bf16.mxu0 %v427_v16  ;;  %402 = vmatprep.mubr.msk.bf16.mxu1 %vm428_vm1, %v427_v16  ;;  %v334_v25 = vld [vmem:[%s545_s1] ss:$0 sm:$0xff]  ;;  %v413_v39 = vld [vmem:[%s547_s5 + $0x28] sm:$0xff]   ;;  %v415_v41 = vld [vmem:[%s547_s5 + $0x18] sm:$0xff]  }
   0x4   :  { %v38_v3 = vsel %vm37_vm0, %v472_v1, 0.0  ;;  %v41_v4 = vsel %vm37_vm0, %v474_v2, 0.0  ;;  %v335_v27 = vld [vmem:[%s546_s2] ss:$0 sm:$0xff]  ;;  %387 = vmatpush3.bf16.msra.mxu1 %v411_v37  ;;  %v416_v42 = vld [vmem:[%s547_s5 + $0x10] sm:$0xff]   ;;  %v417_v43 = vld [vmem:[%s547_s5 + $0x8] sm:$0xff]  }
   0x5   :  { %39 = vadd.xlane.f32.xlu0 %v38_v3  ;;  %388 = vmatprep.subr.bf16.mxu1 %v427_v16  ;;  %v414_v40 = vld [vmem:[%s547_s5 + $0x20] sm:$0xff]  }
   0x6   :  { %381 = vmatpush3.bf16.msra.mxu0 %v409_v17  ;;  %v418_v44 = vld [vmem:[%s547_s5] sm:$0xff]  }
   0x7   :  { %v338_v45 = vld [vmem:[%s548_s4] ss:$0 sm:$0xff] }
   0x8   :  { %389 = vmatpush3.bf16.msra.mxu1 %v412_v38 }
   0x9   :  { %42 = vadd.xlane.f32.xlu0 %v41_v4  ;;  %390 = vmatprep.subr.bf16.mxu1 %v427_v16 }
   0xc   :  { %391 = vmatpush3.bf16.msra.mxu1 %v413_v39 }
   0xd   :  { %392 = vmatprep.subr.bf16.mxu1 %v427_v16 }
  0x10   :  { %393 = vmatpush3.bf16.msra.mxu1 %v414_v40 }
  0x11   :  { %394 = vmatprep.subr.bf16.mxu1 %v427_v16 }
  0x14   :  { %395 = vmatpush3.bf16.msra.mxu1 %v415_v41 }
  0x15   :  { %396 = vmatprep.subr.bf16.mxu1 %v427_v16 }
  0x18   :  { %397 = vmatpush3.bf16.msra.mxu1 %v416_v42 }
  0x19   :  { %398 = vmatprep.subr.bf16.mxu1 %v427_v16 }
  0x1c   :  { %399 = vmatpush3.bf16.msra.mxu1 %v417_v43 }
  0x1d   :  { %400 = vmatprep.subr.bf16.mxu1 %v427_v16 }
  0x20   :  { %401 = vmatpush3.bf16.msra.mxu1 %v418_v44 }
  0x8e   :  { %v40_v5 = vpop.xlane.xlu0 %39 }
  0x8f   :  { %v45_v6 = vmul.f32 0.03125, %v40_v5 }
  0x91   :  { %v47_v7 = vsub.f32 %v472_v1, %v45_v6 }
  0x92   :  { %v43_v8 = vpop.xlane.xlu0 %42 }
  0x93   :  { %v46_v9 = vmul.f32 0.03125, %v43_v8  ;;  %v49_v10 = vmul.f32 %v47_v7, %v47_v7 }
  0x95   :  { %v48_v11 = vsub.f32 %v474_v2, %v46_v9  ;;  %v51_v12 = vsel %vm37_vm0, %v49_v10, 0.0  ;;  %v187_v9 = vld [vmem:[#allocation3] sm:$0xff] }
  0x96   :  { %52 = vadd.xlane.f32.xlu1 %v51_v12 }
  0x97   :  { %v50_v13 = vmul.f32 %v48_v11, %v48_v11 }
  0x99   :  { %v54_v14 = vsel %vm37_vm0, %v50_v13, 0.0  ;;  %v188_v13 = vld [vmem:[#allocation3 + $0x8] sm:$0xff] }
  0x9a   :  { %55 = vadd.xlane.f32.xlu1 %v54_v14 }
 0x11f   :  { %v53_v18 = vpop.xlane.xlu1 %52 }
 0x120   :  { %v57_v19 = vmul.f32 0.03125, %v53_v18  ;;  %v351_v18 = vld [vmem:[%s549_s6] ss:$0 sm:$0xff] }
 0x122   :  { %v59_v20 = vadd.f32 1e-05, %v57_v19 }
 0x123   :  { %v56_v21 = vpop.xlane.xlu1 %55 }
 0x124   :  { %419 = vrsqrt.f32 %v59_v20  ;;  %v58_v22 = vmul.f32 0.03125, %v56_v21 }
 0x126   :  { %v60_v23 = vadd.f32 1e-05, %v58_v22 }
 0x128   :  { %421 = vrsqrt.f32 %v60_v23 }
 0x131   :  { %v420_v24 = vpop.eup %419 }
 0x132   :  { %v63_v26 = vmul.f32 %v420_v24, %v47_v7 }
 0x134   :  { %v71_v28 = vmul.f32 %v334_v25, %v63_v26 }
 0x135   :  { %v422_v29 = vpop.eup %421 }
 0x136   :  { %v79_v30 = vadd.f32 %v335_v27, %v71_v28  ;;  %v64_v31 = vmul.f32 %v422_v29, %v48_v11 }
 0x138   :  { %v354_v32 = vpack.c.bf16 %v79_v30, %v79_v30  ;;  %v72_v33 = vmul.f32 %v334_v25, %v64_v31 }
 0x13a   :  { %90 = vst.msk [vmem:[#allocation2] sm:$0xf] %vm89_vm2, %v354_v32  ;;  %v80_v34 = vadd.f32 %v335_v27, %v72_v33 }
 0x13c   :  { %v355_v35 = vpack.c.bf16 %v80_v34, %v80_v34 }
 0x13e   :  { %91 = vst.msk [vmem:[#allocation2 + $0x4] sm:$0xf] %vm89_vm2, %v355_v35 }
 0x145   :  { %v410_v36 = vld [vmem:[#allocation2] sm:$0xff]  }
 0x146   :  { %383 = vmatmul.mubr.msk.bf16.vlgmr.msra.gmra.mxu0 %vm37_vm0, %v410_v36 }
 0x206   :  { %v162_v46 = vpop.f32.mrf.mxu0 }
 0x207   :  { %v163_v47 = vadd.f32 %v338_v45, %v162_v46 }
 0x208   :  { %v384_v48 = vpop.f32.mrf.mxu0 }
 0x209   :  { %v171_v49 = vmul.f32 0.044715, %v163_v47  ;;  %v169_v3 = vmul.f32 0.5, %v163_v47 }
 0x20a   :  { %v165_v50 = vpop.f32.mrf.mxu0 }
 0x20b   :  { %v173_v51 = vmul.f32 %v171_v49, %v163_v47  ;;  %v166_v52 = vadd.f32 %v338_v45, %v165_v50 }
 0x20c   :  { %v385_v53 = vpop.f32.mrf.mxu0 }
 0x20d   :  { %v175_v54 = vmul.f32 %v173_v51, %v163_v47  ;;  %v172_v55 = vmul.f32 0.044715, %v166_v52  ;;  %v170_v4 = vmul.f32 0.5, %v166_v52 }
 0x20f   :  { %v174_v56 = vmul.f32 %v172_v55, %v166_v52  ;;  %v177_v57 = vadd.f32 %v175_v54, %v163_v47 }
 0x211   :  { %v176_v58 = vmul.f32 %v174_v56, %v166_v52  ;;  %v179_v59 = vmul.f32 0.7978846, %v177_v57 }
 0x213   :  { %v178_v60 = vadd.f32 %v176_v58, %v166_v52  ;;  %423 = vtanh.f32 %v179_v59 }
 0x215   :  { %v180_v61 = vmul.f32 0.7978846, %v178_v60 }
 0x217   :  { %425 = vtanh.f32 %v180_v61 }
 0x220   :  { %v424_v62 = vpop.eup %423 }
 0x221   :  { %v183_v63 = vadd.f32 1.0, %v424_v62 }
 0x223   :  { %v185_v6 = vmul.f32 %v183_v63, %v169_v3 }
 0x224   :  { %v426_v0 = vpop.eup %425 }
 0x225   :  { %v184_v5 = vadd.f32 1.0, %v426_v0 }
 0x227   :  { %v186_v7 = vmul.f32 %v184_v5, %v170_v4 }
 0x229   :  { %v189_v8 = vpack.c.bf16 %v186_v7, %v185_v6 }
 0x22b   :  { %403 = vmatmul.mubr.bf16.vlgmr.msra.gmra.mxu1 %v189_v8 }
 0x2eb   :  { %v288_v10 = vpop.f32.mrf.mxu1 }
 0x2ec   :  { %v295_v11 = vadd.f32 %v288_v10, %v187_v9 }
 0x2ed   :  { %v404_v12 = vpop.f32.mrf.mxu1 }
 0x2ee   :  { %297 = vst.msk [vmem:[#allocation3] sm:$0xff] %vm37_vm0, %v295_v11 }
 0x2ef   :  { %v291_v14 = vpop.f32.mrf.mxu1 }
 0x2f0   :  { %v296_v15 = vadd.f32 %v291_v14, %v188_v13 }
 0x2f1   :  { %v405_v16 = vpop.f32.mrf.mxu1 }
 0x2f2   :  { %298 = vst.msk [vmem:[#allocation3 + $0x8] sm:$0xff] %vm37_vm0, %v296_v15 }
 0x2f5   :  { %v306_v17 = vld [vmem:[#allocation3] sm:$0xff] }
 0x2f6   :  { %v308_v19 = vadd.f32 %v472_v1, %v306_v17 }
 0x2f8   :  { %v317_v20 = vadd.f32 %v351_v18, %v308_v19 }
 0x2f9   :  { %v307_v21 = vld [vmem:[#allocation3 + $0x8] sm:$0xff] }
 0x2fa   :  { %v356_v22 = vpack.c.bf16 %v317_v20, %v317_v20  ;;  %v309_v23 = vadd.f32 %v474_v2, %v307_v21 }
 0x2fc   :  { %328 = vst.msk [vmem:[%s550_s7] sm:$0xf] %vm89_vm2, %v356_v22  ;;  %v318_v24 = vadd.f32 %v351_v18, %v309_v23 }
 0x2fe   :  { %v357_v25 = vpack.c.bf16 %v318_v24, %v318_v24 }
 0x300   :  { %329 = vst.msk [vmem:[%s550_s7 + $0x4] sm:$0xf] %vm89_vm2, %v357_v25 }

// kernel: paraphrase_gpt_forward.13
= control target key start
LH: loop header
LB: loop body
LE: loop exit
PB: predicated region body
PF: predicated region fallthrough
CT: control target
= control target key end

     0   :  { %vm23_vm0 = vcmask 254976   ;;  %s219_s0 = inlined_call_operand.vmem [shape: bf16[2,32], index: 0, kind: input, shape index: {}]   ;;  %s220_s1 = inlined_call_operand.vmem [shape: f32[1,32], index: 1, kind: input, shape index: {}]   ;;  %s221_s2 = inlined_call_operand.vmem [shape: f32[1,32], index: 2, kind: input, shape index: {}]   ;;  %s222_s3 = inlined_call_operand.vmem [shape: bf16[32,128], index: 3, kind: input, shape index: {}]   ;;  %s223_s4 = inlined_call_operand.hbm [shape: f32[2,128], index: 4, kind: output, shape index: {}]  }
   0x1   :  { %v19_v0 = vld [vmem:[%s219_s0] sm:$0x1] }
   0x2   :  { %v20_v1 = vunpack.c.l.bf16 %v19_v0 }
   0x3   :  { %9 = vsyncpa [#allocation3], 0  ;;  %v147_v8 = vld [vmem:[%s222_s3 + $0x8] sm:$0xff]   ;;  %v173_v9 = vmov 0.0   ;;  %vm174_vm1 = vmmov 0   ;;  %v148_v10 = vld [vmem:[%s222_s3] sm:$0xff]  }
   0x4   :  { %v24_v2 = vsel %vm23_vm0, %v20_v1, 0.0  ;;  %136 = vmatprep.subr.bf16.mxu0 %v173_v9  ;;  %140 = vmatprep.mubr.msk.bf16.mxu0 %vm174_vm1, %v173_v9  ;;  %v128_v15 = vld [vmem:[%s220_s1] ss:$0 sm:$0xff]  ;;  %vm69_vm2 = vcmask 261120   ;;  %s175_s3 = smov [#allocation2]  }
   0x5   :  { %25 = vadd.xlane.f32.xlu0 %v24_v2  ;;  %137 = vmatpush3.bf16.msra.mxu0 %v147_v8  ;;  %v129_v17 = vld [vmem:[%s221_s2] ss:$0 sm:$0xff]  ;;  %s120_s24 = sshll.u32 %s175_s3, 4  ;;  %s121_s24 = int_to_ptr.vmem [resolvable:$true] %s120_s24 }
   0x6   :  { %138 = vmatprep.subr.bf16.mxu0 %v173_v9  ;;  %s151_s25 = scalar_lea.vmem %s121_s24, 32  ;;  %p156_p1 = scmp.lt.s32.totalorder %s121_s24, %s121_s24 }
   0x7   :  { %p152_p0 = scmp.ne.s32.totalorder %s121_s24, %s151_s25  ;;  %p157_p2 = scmp.lt.s32.totalorder %s151_s25, %s151_s25 }
   0x9   :  { %139 = vmatpush3.bf16.msra.mxu0 %v148_v10  ;;  %p158_p3 = por %p157_p2, %p156_p1 }
   0xb   :  { %p159_p4 = pnand %p158_p3, %p152_p0 }
  0x8e   :  { %v26_v3 = vpop.xlane.xlu0 %25 }
  0x8f   :  { %v28_v4 = vmul.f32 0.03125, %v26_v3 }
  0x91   :  { %v29_v5 = vsub.f32 %v20_v1, %v28_v4 }
  0x93   :  { %v30_v6 = vmul.f32 %v29_v5, %v29_v5 }
  0x95   :  { %v31_v7 = vsel %vm23_vm0, %v30_v6, 0.0 }
  0x96   :  { %32 = vadd.xlane.f32.xlu0 %v31_v7 }
 0x11f   :  { %v33_v11 = vpop.xlane.xlu0 %32 }
 0x120   :  { %v34_v12 = vmul.f32 0.03125, %v33_v11 }
 0x122   :  { %v35_v13 = vadd.f32 1e-05, %v34_v12 }
 0x124   :  { %149 = vrsqrt.f32 %v35_v13 }
 0x131   :  { %v150_v14 = vpop.eup %149 }
 0x132   :  { %v37_v16 = vmul.f32 %v150_v14, %v29_v5 }
 0x134   :  { %v44_v18 = vmul.f32 %v128_v15, %v37_v16 }
 0x136   :  { %v51_v19 = vadd.f32 %v129_v17, %v44_v18 }
 0x138   :  { %v52_v20 = vpack.c.bf16 %v51_v19, %v51_v19 }
 0x13a   :  { %141 = vmatmul.mubr.msk.bf16.vlgmr.msra.gmra.mxu0 %vm69_vm2, %v52_v20 }
 0x1fa   :  { %v107_v21 = vpop.f32.mrf.mxu0 }
 0x1fb   :  { %113 = vst [vmem:[#allocation2] sm:$0x3] %v107_v21 }
 0x1fc   :  { %v142_v22 = vpop.f32.mrf.mxu0 }
 0x1fd   :  { %162 = shalt.err (!%p159_p4)
}
 0x1fe   :  { %123 = dma.vmem_to_hbm [thread:$0]  %s121_s24, 32, %s223_s4, [#allocation3]   ;;  %v110_v23 = vpop.f32.mrf.mxu0 }
 0x200   :  { %v143_v24 = vpop.f32.mrf.mxu0 }
 0x201   :  { %171 = dma.done.wait [#allocation3], 32  }
 0x202   :  { %172 = vsyncadd [#allocation3], 4294967264 }
 0x203   :  { %127 = vsyncpa [#allocation3], 1 }

</bundles_post_ra>
